<compile_context>
chip_gen: v5e
topology: v5e:2x2
jax: 0.10.0
libtpu: 0.0.40
codegen_flags: <defaults>
</compile_context>

<pallas_src>
import functools

import jax
import jax.numpy as jnp
from jax.experimental import pallas as pl
from jax.experimental.pallas import tpu as pltpu  # noqa: F401  (TPU backend)

LANE_PAD = 128  # lane-dense padding for tiny head outputs (n_class=3, n_tag=5)


# ----------------------------- Pallas kernels -----------------------------

def _bilstm_kernel(x_ref, m_ref, wih_ref, whh_ref, b_ref, hs_ref):
    """Fused bidirectional LSTM.

    x_ref   : [T*B, D]  time-major flattened input (row = t*B + b)
    m_ref   : [T*B, 1]  validity mask (1.0 = real token)
    wih_ref : [D, 8H]   [fwd W_ih^T | bwd W_ih^T], gates reordered (i,f,o,g)
    whh_ref : [H, 8H]   [fwd W_hh^T | bwd W_hh^T], gates reordered (i,f,o,g)
    b_ref   : [1, 8H]   [fwd b | bwd b]            (b = b_ih + b_hh)
    hs_ref  : [B, T, 2H] output, lanes 0:H = forward, H:2H = backward
    """
    B, T, H2 = hs_ref.shape
    H = H2 // 2
    G = 4 * H

    # Prologue: input projection for BOTH directions in one MXU push,
    # bias folded in (removes a per-step VMEM broadcast-add).
    gx = jnp.dot(x_ref[...], wih_ref[...],
                 preferred_element_type=jnp.float32) + b_ref[...]     # [T*B, 8H]
    whh = whh_ref[...]                                                # [H, 8H]
    m = m_ref[...]                                                    # [T*B, 1]

    # Recurrent state for both directions lives in vregs across the
    # fully-unrolled time loop (rows 0:B = forward, B:2B = backward).
    h = jnp.zeros((2 * B, H), jnp.float32)
    c = jnp.zeros((2 * B, H), jnp.float32)

    # TODO(synk): on v7x the two directions could be split across the two
    # TensorCores (core_map / parallel grid axis) instead of row-stacked.
    for s in range(T):                       # static T -> full unroll, all-static slices
        tf = s                               # forward time index
        tb = T - 1 - s                       # backward time index (reverse iteration)

        # Single recurrent matmul for both directions: [2B, H] x [H, 8H].
        gh = jnp.dot(h, whh, preferred_element_type=jnp.float32)      # [2B, 8H]
        gates = jnp.concatenate(
            [gx[tf * B:(tf + 1) * B, 0:G] + gh[0:B, 0:G],
             gx[tb * B:(tb + 1) * B, G:2 * G] + gh[B:2 * B, G:2 * G]],
            axis=0)                                                   # [2B, 4H] (i,f,o,g)

        sig = jax.nn.sigmoid(gates[:, 0:3 * H])      # contiguous i,f,o
        g_t = jnp.tanh(gates[:, 3 * H:4 * H])        # g
        i_t = sig[:, 0:H]
        f_t = sig[:, H:2 * H]
        o_t = sig[:, 2 * H:3 * H]

        c_new = f_t * c + i_t * g_t
        h_new = o_t * jnp.tanh(c_new)

        keep = jnp.concatenate([m[tf * B:(tf + 1) * B, :],
                                m[tb * B:(tb + 1) * B, :]], axis=0) > 0.0   # [2B, 1]
        # pack_padded semantics: freeze state and emit zeros past seq_length.
        h = jnp.where(keep, h_new, h)
        c = jnp.where(keep, c_new, c)
        out = jnp.where(keep, h_new, 0.0)                              # [2B, H]

        hs_ref[:, tf:tf + 1, 0:H] = out[0:B].reshape(B, 1, H)          # forward
        hs_ref[:, tb:tb + 1, H:2 * H] = out[B:2 * B].reshape(B, 1, H)  # backward


def _heads_kernel(hs_ref, mask_ref, watt_ref, batt_ref, vatt_ref,
                  wmlp_ref, bmlp_ref, wcls_ref, bcls_ref, wtag_ref, btag_ref,
                  logits_ref, tags_ref):
    """Fused self-attention pooling + mlp/classify + word2sentiment_tag."""
    hs = hs_ref[...]                                   # [B, T, 2H]
    B, T, D2 = hs.shape
    hs2 = hs.reshape(B * T, D2)                        # [B*T, 2H]

    # SelfAttention: alpha = softmax(mask(v^T tanh(W hs + b)))
    u = jnp.tanh(jnp.dot(hs2, watt_ref[...],
                         preferred_element_type=jnp.float32) + batt_ref[...])   # [B*T, A]
    scores = jnp.dot(u, vatt_ref[...],
                     preferred_element_type=jnp.float32).reshape(B, T)
    scores = jnp.where(mask_ref[...] > 0.0, scores, -1e30)
    smax = jnp.max(scores, axis=1, keepdims=True)
    e = jnp.exp(scores - smax)
    alpha = e / jnp.sum(e, axis=1, keepdims=True)                                # [B, T]
    sentence = jnp.sum(alpha[:, :, None] * hs, axis=1)                           # [B, 2H]
    # dropout on sentence: identity in eval mode

    # mlp_layer -> classify_layer (classify weights zero-padded to 128 lanes)
    hid = jnp.dot(sentence, wmlp_ref[...],
                  preferred_element_type=jnp.float32) + bmlp_ref[...]            # [B, mlp]
    logits_ref[...] = jnp.dot(hid, wcls_ref[...],
                              preferred_element_type=jnp.float32) + bcls_ref[...]

    # word2sentiment_tag on hs.view(-1, 2H) (weights zero-padded to 128 lanes)
    tags_ref[...] = jnp.dot(hs2, wtag_ref[...],
                            preferred_element_type=jnp.float32) + btag_ref[...]


# ----------------------------- parameter prep -----------------------------

def _reorder_gate_cols(wt):
    """Columns in PyTorch gate order (i, f, g, o) -> (i, f, o, g)."""
    h = wt.shape[-1] // 4
    return jnp.concatenate([wt[..., :2 * h], wt[..., 3 * h:], wt[..., 2 * h:3 * h]],
                           axis=-1)


def _pad_lanes(w, n=LANE_PAD):
    return jnp.pad(w, ((0, 0), (0, n - w.shape[1])))


def prepare_kernel_params(p):
    """One-time conversion of PyTorch-layout params to kernel-ready layout."""
    H = p["w_hh_f"].shape[1]
    wih_f = _reorder_gate_cols(jnp.transpose(p["w_ih_f"]))      # [D, 4H]
    wih_b = _reorder_gate_cols(jnp.transpose(p["w_ih_b"]))
    whh_f = _reorder_gate_cols(jnp.transpose(p["w_hh_f"]))      # [H, 4H]
    whh_b = _reorder_gate_cols(jnp.transpose(p["w_hh_b"]))
    b_f = _reorder_gate_cols(p["b_f"].reshape(1, 4 * H))
    b_b = _reorder_gate_cols(p["b_b"].reshape(1, 4 * H))
    return {
        "we": p["we"],
        "tag_emb": p["tag_emb"],
        "wih_stack": jnp.concatenate([wih_f, wih_b], axis=1),   # [D, 8H]
        "whh_stack": jnp.concatenate([whh_f, whh_b], axis=1),   # [H, 8H]
        "b_stack": jnp.concatenate([b_f, b_b], axis=1),         # [1, 8H]
        "w_att_T": jnp.transpose(p["w_att"]),                   # [2H, A]
        "b_att": p["b_att"].reshape(1, -1),                     # [1, A]
        "v_att": p["v_att"].reshape(-1, 1),                     # [A, 1]
        "w_mlp_T": jnp.transpose(p["w_mlp"]),                   # [2H, mlp]
        "b_mlp": p["b_mlp"].reshape(1, -1),                     # [1, mlp]
        "w_cls_pad": _pad_lanes(jnp.transpose(p["w_cls"])),     # [mlp, 128]
        "b_cls_pad": _pad_lanes(p["b_cls"].reshape(1, -1)),     # [1, 128]
        "w_tag_pad": _pad_lanes(jnp.transpose(p["w_tag"])),     # [2H, 128]
        "b_tag_pad": _pad_lanes(p["b_tag"].reshape(1, -1)),     # [1, 128]
    }


def init_params(key, vocab_size, word_dim, n_sentiment_tag, tag_dim,
                lstm_dim, mlp_dim, n_class):
    assert lstm_dim == word_dim + tag_dim
    ks = jax.random.split(key, 16)
    s = 0.1
    H = lstm_dim
    D = lstm_dim
    A = lstm_dim                       # SelfAttention(2*lstm_dim, lstm_dim)
    tag_emb = s * jax.random.normal(ks[1], (n_sentiment_tag + 1, tag_dim), jnp.float32)
    tag_emb = tag_emb.at[0].set(0.0)   # padding_idx=0
    return {
        "we": s * jax.random.normal(ks[0], (vocab_size, word_dim), jnp.float32),
        "tag_emb": tag_emb,
        # BiLSTM (PyTorch layout: W_ih [4H, D], W_hh [4H, H], b = b_ih + b_hh)
        "w_ih_f": s * jax.random.normal(ks[2], (4 * H, D), jnp.float32),
        "w_hh_f": s * jax.random.normal(ks[3], (4 * H, H), jnp.float32),
        "b_f":    s * jax.random.normal(ks[4], (4 * H,), jnp.float32),
        "w_ih_b": s * jax.random.normal(ks[5], (4 * H, D), jnp.float32),
        "w_hh_b": s * jax.random.normal(ks[6], (4 * H, H), jnp.float32),
        "b_b":    s * jax.random.normal(ks[7], (4 * H,), jnp.float32),
        # SelfAttention
        "w_att": s * jax.random.normal(ks[8], (A, 2 * H), jnp.float32),
        "b_att": s * jax.random.normal(ks[9], (A,), jnp.float32),
        "v_att": s * jax.random.normal(ks[10], (A,), jnp.float32),
        # heads
        "w_mlp": s * jax.random.normal(ks[11], (mlp_dim, 2 * H), jnp.float32),
        "b_mlp": s * jax.random.normal(ks[12], (mlp_dim,), jnp.float32),
        "w_cls": s * jax.random.normal(ks[13], (n_class, mlp_dim), jnp.float32),
        "b_cls": s * jax.random.normal(ks[14], (n_class,), jnp.float32),
        "w_tag": s * jax.random.normal(ks[15], (n_sentiment_tag, 2 * H), jnp.float32),
        "b_tag": jnp.zeros((n_sentiment_tag,), jnp.float32),
    }


# ----------------------------- model forward -----------------------------

@functools.partial(jax.jit, static_argnames=("n_class", "n_tag"))
def forward(kp, word_inputs, tag_inputs, seq_lengths, mask, *, n_class, n_tag):
    B, T = word_inputs.shape
    H = kp["whh_stack"].shape[0]

    # --- embeddings (gather glue in XLA) ---
    word_emb = kp["we"][word_inputs]                              # [B, T, word_dim]
    tag_emb = kp["tag_emb"][tag_inputs + 1]                       # [B, T, tag_dim]
    x = jnp.concatenate([word_emb, tag_emb], axis=2).astype(jnp.float32)  # [B, T, D]
    D = x.shape[-1]
    # dropout(p=0.5): identity in eval mode

    # --- fused BiLSTM (single Pallas kernel, no grid) ---
    valid = (jnp.arange(T)[None, :] < seq_lengths[:, None]).astype(jnp.float32)  # [B, T]
    x_flat = jnp.transpose(x, (1, 0, 2)).reshape(T * B, D)        # row = t*B + b
    m_flat = jnp.transpose(valid).reshape(T * B, 1)

    hs = pl.pallas_call(
        _bilstm_kernel,
        out_shape=jax.ShapeDtypeStruct((B, T, 2 * H), jnp.float32),
    )(x_flat, m_flat, kp["wih_stack"], kp["whh_stack"], kp["b_stack"])   # [B, T, 2H]

    # --- fused attention pooling + heads (single Pallas kernel) ---
    logits_pad, tags_pad = pl.pallas_call(
        _heads_kernel,
        out_shape=(jax.ShapeDtypeStruct((B, LANE_PAD), jnp.float32),
                   jax.ShapeDtypeStruct((B * T, LANE_PAD), jnp.float32)),
    )(hs, mask.astype(jnp.float32),
      kp["w_att_T"], kp["b_att"], kp["v_att"],
      kp["w_mlp_T"], kp["b_mlp"],
      kp["w_cls_pad"], kp["b_cls_pad"],
      kp["w_tag_pad"], kp["b_tag_pad"])

    return logits_pad[:, :n_class], tags_pad[:, :n_tag]


# ----------------------------- main -----------------------------

if __name__ == "__main__":
    vocab_size = 50
    word_dim = 20
    n_sentiment_tag = 5
    tag_dim = 12
    lstm_dim = word_dim + tag_dim      # 32
    mlp_dim = 32
    n_class = 3
    B, T = 2, 8

    key = jax.random.PRNGKey(0)
    kp_key, kw, kt = jax.random.split(key, 3)
    params = init_params(kp_key, vocab_size, word_dim, n_sentiment_tag, tag_dim,
                         lstm_dim, mlp_dim, n_class)
    kparams = prepare_kernel_params(params)   # one-time weight layout conversion

    seq_lengths = jnp.array([T, 5], dtype=jnp.int32)
    valid = (jnp.arange(T)[None, :] < seq_lengths[:, None])
    mask = valid.astype(jnp.float32)                                   # [B, T]
    word_inputs = jax.random.randint(kw, (B, T), 0, vocab_size, jnp.int32)
    word_inputs = jnp.where(valid, word_inputs, 0)
    tag_raw = jax.random.randint(kt, (B, T), 0, n_sentiment_tag, jnp.int32)
    tag_inputs = jnp.where(valid, tag_raw, -1)                         # -1 -> padding_idx 0

    logits, tags_logits = forward(kparams, word_inputs, tag_inputs, seq_lengths, mask,
                                  n_class=n_class, n_tag=n_sentiment_tag)
    logits = jax.block_until_ready(logits)
    tags_logits = jax.block_until_ready(tags_logits)

    assert logits.shape == (B, n_class)
    assert tags_logits.shape == (B * T, n_sentiment_tag)
    print("KERNEL_OK")
</pallas_src>

<mosaic_0001>
module attributes {stable_mosaic.version = 11 : i64} {
  func.func @_heads_kernel(%arg0: memref<2x8x64xf32, #tpu.memory_space<vmem>>, %arg1: memref<2x8xf32, #tpu.memory_space<vmem>>, %arg2: memref<64x32xf32, #tpu.memory_space<vmem>>, %arg3: memref<1x32xf32, #tpu.memory_space<vmem>>, %arg4: memref<32x1xf32, #tpu.memory_space<vmem>>, %arg5: memref<64x32xf32, #tpu.memory_space<vmem>>, %arg6: memref<1x32xf32, #tpu.memory_space<vmem>>, %arg7: memref<32x128xf32, #tpu.memory_space<vmem>>, %arg8: memref<1x128xf32, #tpu.memory_space<vmem>>, %arg9: memref<64x128xf32, #tpu.memory_space<vmem>>, %arg10: memref<1x128xf32, #tpu.memory_space<vmem>>, %arg11: memref<2x128xf32, #tpu.memory_space<vmem>>, %arg12: memref<16x128xf32, #tpu.memory_space<vmem>>) attributes {dimension_semantics = [], scalar_prefetch = 0 : i64, scratch_operands = 0 : i64, tpu.core_type = #tpu.core_type<tc>} {
    %c0 = arith.constant 0 : index
    %c0_0 = arith.constant 0 : index
    %c0_1 = arith.constant 0 : index
    %0 = vector.load %arg0[%c0, %c0_0, %c0_1] : memref<2x8x64xf32, #tpu.memory_space<vmem>>, vector<2x8x64xf32>
    %1 = vector.shape_cast %0 : vector<2x8x64xf32> to vector<16x64xf32>
    %c0_2 = arith.constant 0 : index
    %c0_3 = arith.constant 0 : index
    %2 = vector.load %arg2[%c0_2, %c0_3] : memref<64x32xf32, #tpu.memory_space<vmem>>, vector<64x32xf32>
    %cst = arith.constant dense<0.000000e+00> : vector<16x32xf32>
    %3 = tpu.matmul %1, %2, %cst {dimension_numbers = #tpu.dot_dimension_numbers<[1], [0], [0], [1], [0, 0, 1, 1], [], []>} : vector<16x64xf32>, vector<64x32xf32>, vector<16x32xf32> -> vector<16x32xf32>
    %c0_4 = arith.constant 0 : index
    %c0_5 = arith.constant 0 : index
    %4 = vector.load %arg3[%c0_4, %c0_5] : memref<1x32xf32, #tpu.memory_space<vmem>>, vector<1x32xf32>
    %5 = vector.broadcast %4 : vector<1x32xf32> to vector<16x32xf32>
    %6 = arith.addf %3, %5 : vector<16x32xf32>
    %7 = math.tanh %6 : vector<16x32xf32>
    %c0_6 = arith.constant 0 : index
    %c0_7 = arith.constant 0 : index
    %8 = vector.load %arg4[%c0_6, %c0_7] : memref<32x1xf32, #tpu.memory_space<vmem>>, vector<32x1xf32>
    %cst_8 = arith.constant dense<0.000000e+00> : vector<16x1xf32>
    %9 = tpu.matmul %7, %8, %cst_8 {dimension_numbers = #tpu.dot_dimension_numbers<[1], [0], [0], [1], [0, 0, 1, 1], [], []>} : vector<16x32xf32>, vector<32x1xf32>, vector<16x1xf32> -> vector<16x1xf32>
    %10 = vector.shape_cast %9 : vector<16x1xf32> to vector<2x8xf32>
    %c0_9 = arith.constant 0 : index
    %c0_10 = arith.constant 0 : index
    %11 = vector.load %arg1[%c0_9, %c0_10] : memref<2x8xf32, #tpu.memory_space<vmem>>, vector<2x8xf32>
    %cst_11 = arith.constant 0.000000e+00 : f32
    %12 = vector.broadcast %cst_11 : f32 to vector<2x8xf32>
    %13 = arith.cmpf ogt, %11, %12 : vector<2x8xf32>
    %cst_12 = arith.constant -1.000000e+30 : f32
    %14 = vector.broadcast %cst_12 : f32 to vector<2x8xf32>
    %15 = arith.select %13, %10, %14 : vector<2x8xi1>, vector<2x8xf32>
    %cst_13 = arith.constant dense<0xFF800000> : vector<2xf32>
    %16 = vector.multi_reduction <maximumf>, %15, %cst_13 [1] : vector<2x8xf32> to vector<2xf32>
    %17 = vector.shape_cast %16 : vector<2xf32> to vector<2x1xf32>
    %18 = vector.broadcast %17 : vector<2x1xf32> to vector<2x8xf32>
    %19 = arith.subf %15, %18 : vector<2x8xf32>
    %20 = math.exp %19 : vector<2x8xf32>
    %cst_14 = arith.constant dense<0.000000e+00> : vector<2xf32>
    %21 = vector.multi_reduction <add>, %20, %cst_14 [1] : vector<2x8xf32> to vector<2xf32>
    %22 = vector.shape_cast %21 : vector<2xf32> to vector<2x1xf32>
    %23 = vector.broadcast %22 : vector<2x1xf32> to vector<2x8xf32>
    %24 = arith.divf %20, %23 : vector<2x8xf32>
    %25 = vector.shape_cast %24 : vector<2x8xf32> to vector<2x8x1xf32>
    %26 = vector.broadcast %25 : vector<2x8x1xf32> to vector<2x8x64xf32>
    %27 = arith.mulf %26, %0 : vector<2x8x64xf32>
    %cst_15 = arith.constant dense<0.000000e+00> : vector<2x64xf32>
    %28 = vector.multi_reduction <add>, %27, %cst_15 [1] : vector<2x8x64xf32> to vector<2x64xf32>
    %c0_16 = arith.constant 0 : index
    %c0_17 = arith.constant 0 : index
    %29 = vector.load %arg5[%c0_16, %c0_17] : memref<64x32xf32, #tpu.memory_space<vmem>>, vector<64x32xf32>
    %cst_18 = arith.constant dense<0.000000e+00> : vector<2x32xf32>
    %30 = tpu.matmul %28, %29, %cst_18 {dimension_numbers = #tpu.dot_dimension_numbers<[1], [0], [0], [1], [0, 0, 1, 1], [], []>} : vector<2x64xf32>, vector<64x32xf32>, vector<2x32xf32> -> vector<2x32xf32>
    %c0_19 = arith.constant 0 : index
    %c0_20 = arith.constant 0 : index
    %31 = vector.load %arg6[%c0_19, %c0_20] : memref<1x32xf32, #tpu.memory_space<vmem>>, vector<1x32xf32>
    %32 = vector.broadcast %31 : vector<1x32xf32> to vector<2x32xf32>
    %33 = arith.addf %30, %32 : vector<2x32xf32>
    %c0_21 = arith.constant 0 : index
    %c0_22 = arith.constant 0 : index
    %34 = vector.load %arg7[%c0_21, %c0_22] : memref<32x128xf32, #tpu.memory_space<vmem>>, vector<32x128xf32>
    %cst_23 = arith.constant dense<0.000000e+00> : vector<2x128xf32>
    %35 = tpu.matmul %33, %34, %cst_23 {dimension_numbers = #tpu.dot_dimension_numbers<[1], [0], [0], [1], [0, 0, 1, 1], [], []>} : vector<2x32xf32>, vector<32x128xf32>, vector<2x128xf32> -> vector<2x128xf32>
    %c0_24 = arith.constant 0 : index
    %c0_25 = arith.constant 0 : index
    %36 = vector.load %arg8[%c0_24, %c0_25] : memref<1x128xf32, #tpu.memory_space<vmem>>, vector<1x128xf32>
    %37 = vector.broadcast %36 : vector<1x128xf32> to vector<2x128xf32>
    %38 = arith.addf %35, %37 : vector<2x128xf32>
    %c0_26 = arith.constant 0 : index
    %c0_27 = arith.constant 0 : index
    %39 = vector.load %arg11[%c0_26, %c0_27] : memref<2x128xf32, #tpu.memory_space<vmem>>, vector<2x128xf32>
    tpu.vector_store %arg11[%c0_26, %c0_27], %38 {strides = array<i32>} : memref<2x128xf32, #tpu.memory_space<vmem>>, vector<2x128xf32>,
    %c0_28 = arith.constant 0 : index
    %c0_29 = arith.constant 0 : index
    %40 = vector.load %arg9[%c0_28, %c0_29] : memref<64x128xf32, #tpu.memory_space<vmem>>, vector<64x128xf32>
    %cst_30 = arith.constant dense<0.000000e+00> : vector<16x128xf32>
    %41 = tpu.matmul %1, %40, %cst_30 {dimension_numbers = #tpu.dot_dimension_numbers<[1], [0], [0], [1], [0, 0, 1, 1], [], []>} : vector<16x64xf32>, vector<64x128xf32>, vector<16x128xf32> -> vector<16x128xf32>
    %c0_31 = arith.constant 0 : index
    %c0_32 = arith.constant 0 : index
    %42 = vector.load %arg10[%c0_31, %c0_32] : memref<1x128xf32, #tpu.memory_space<vmem>>, vector<1x128xf32>
    %43 = vector.broadcast %42 : vector<1x128xf32> to vector<16x128xf32>
    %44 = arith.addf %41, %43 : vector<16x128xf32>
    %c0_33 = arith.constant 0 : index
    %c0_34 = arith.constant 0 : index
    %45 = vector.load %arg12[%c0_33, %c0_34] : memref<16x128xf32, #tpu.memory_space<vmem>>, vector<16x128xf32>
    tpu.vector_store %arg12[%c0_33, %c0_34], %44 {strides = array<i32>} : memref<16x128xf32, #tpu.memory_space<vmem>>, vector<16x128xf32>,
    return
  }
}

module attributes {stable_mosaic.version = 11 : i64} {
  func.func @_bilstm_kernel(%arg0: memref<16x32xf32, #tpu.memory_space<vmem>>, %arg1: memref<16x1xf32, #tpu.memory_space<vmem>>, %arg2: memref<32x256xf32, #tpu.memory_space<vmem>>, %arg3: memref<32x256xf32, #tpu.memory_space<vmem>>, %arg4: memref<1x256xf32, #tpu.memory_space<vmem>>, %arg5: memref<2x8x64xf32, #tpu.memory_space<vmem>>) attributes {dimension_semantics = [], scalar_prefetch = 0 : i64, scratch_operands = 0 : i64, tpu.core_type = #tpu.core_type<tc>} {
    %c0 = arith.constant 0 : index
    %c0_0 = arith.constant 0 : index
    %0 = vector.load %arg0[%c0, %c0_0] : memref<16x32xf32, #tpu.memory_space<vmem>>, vector<16x32xf32>
    %c0_1 = arith.constant 0 : index
    %c0_2 = arith.constant 0 : index
    %1 = vector.load %arg2[%c0_1, %c0_2] : memref<32x256xf32, #tpu.memory_space<vmem>>, vector<32x256xf32>
    %cst = arith.constant dense<0.000000e+00> : vector<16x256xf32>
    %2 = tpu.matmul %0, %1, %cst {dimension_numbers = #tpu.dot_dimension_numbers<[1], [0], [0], [1], [0, 0, 1, 1], [], []>} : vector<16x32xf32>, vector<32x256xf32>, vector<16x256xf32> -> vector<16x256xf32>
    %c0_3 = arith.constant 0 : index
    %c0_4 = arith.constant 0 : index
    %3 = vector.load %arg4[%c0_3, %c0_4] : memref<1x256xf32, #tpu.memory_space<vmem>>, vector<1x256xf32>
    %4 = vector.broadcast %3 : vector<1x256xf32> to vector<16x256xf32>
    %5 = arith.addf %2, %4 : vector<16x256xf32>
    %c0_5 = arith.constant 0 : index
    %c0_6 = arith.constant 0 : index
    %6 = vector.load %arg3[%c0_5, %c0_6] : memref<32x256xf32, #tpu.memory_space<vmem>>, vector<32x256xf32>
    %c0_7 = arith.constant 0 : index
    %c0_8 = arith.constant 0 : index
    %7 = vector.load %arg1[%c0_7, %c0_8] : memref<16x1xf32, #tpu.memory_space<vmem>>, vector<16x1xf32>
    %cst_9 = arith.constant 0.000000e+00 : f32
    %8 = vector.broadcast %cst_9 : f32 to vector<4x32xf32>
    %cst_10 = arith.constant 0.000000e+00 : f32
    %9 = vector.broadcast %cst_10 : f32 to vector<4x32xf32>
    %cst_11 = arith.constant dense<0.000000e+00> : vector<4x256xf32>
    %10 = tpu.matmul %8, %6, %cst_11 {dimension_numbers = #tpu.dot_dimension_numbers<[1], [0], [0], [1], [0, 0, 1, 1], [], []>} : vector<4x32xf32>, vector<32x256xf32>, vector<4x256xf32> -> vector<4x256xf32>
    %11 = vector.extract_strided_slice %5 {offsets = [0, 0], sizes = [2, 128], strides = [1, 1]} : vector<16x256xf32> to vector<2x128xf32>
    %12 = vector.extract_strided_slice %10 {offsets = [0, 0], sizes = [2, 128], strides = [1, 1]} : vector<4x256xf32> to vector<2x128xf32>
    %13 = arith.addf %11, %12 : vector<2x128xf32>
    %14 = vector.extract_strided_slice %5 {offsets = [14, 128], sizes = [2, 128], strides = [1, 1]} : vector<16x256xf32> to vector<2x128xf32>
    %15 = vector.extract_strided_slice %10 {offsets = [2, 128], sizes = [2, 128], strides = [1, 1]} : vector<4x256xf32> to vector<2x128xf32>
    %16 = arith.addf %14, %15 : vector<2x128xf32>
    %17 = tpu.concatenate %13, %16 in 0 : vector<2x128xf32>, vector<2x128xf32> -> vector<4x128xf32>
    %18 = vector.extract_strided_slice %17 {offsets = [0, 0], sizes = [4, 96], strides = [1, 1]} : vector<4x128xf32> to vector<4x96xf32>
    %19 = arith.negf %18 : vector<4x96xf32>
    %20 = math.exp %19 : vector<4x96xf32>
    %cst_12 = arith.constant 1.000000e+00 : f32
    %21 = vector.broadcast %cst_12 : f32 to vector<4x96xf32>
    %22 = arith.addf %21, %20 : vector<4x96xf32>
    %23 = arith.divf %21, %22 : vector<4x96xf32>
    %24 = vector.extract_strided_slice %17 {offsets = [0, 96], sizes = [4, 32], strides = [1, 1]} : vector<4x128xf32> to vector<4x32xf32>
    %25 = math.tanh %24 : vector<4x32xf32>
    %26 = vector.extract_strided_slice %23 {offsets = [0, 0], sizes = [4, 32], strides = [1, 1]} : vector<4x96xf32> to vector<4x32xf32>
    %27 = vector.extract_strided_slice %23 {offsets = [0, 32], sizes = [4, 32], strides = [1, 1]} : vector<4x96xf32> to vector<4x32xf32>
    %28 = vector.extract_strided_slice %23 {offsets = [0, 64], sizes = [4, 32], strides = [1, 1]} : vector<4x96xf32> to vector<4x32xf32>
    %29 = arith.mulf %27, %9 : vector<4x32xf32>
    %30 = arith.mulf %26, %25 : vector<4x32xf32>
    %31 = arith.addf %29, %30 : vector<4x32xf32>
    %32 = math.tanh %31 : vector<4x32xf32>
    %33 = arith.mulf %28, %32 : vector<4x32xf32>
    %34 = vector.extract_strided_slice %7 {offsets = [0, 0], sizes = [2, 1], strides = [1, 1]} : vector<16x1xf32> to vector<2x1xf32>
    %35 = vector.extract_strided_slice %7 {offsets = [14, 0], sizes = [2, 1], strides = [1, 1]} : vector<16x1xf32> to vector<2x1xf32>
    %36 = tpu.concatenate %34, %35 in 0 : vector<2x1xf32>, vector<2x1xf32> -> vector<4x1xf32>
    %cst_13 = arith.constant 0.000000e+00 : f32
    %37 = vector.broadcast %cst_13 : f32 to vector<4x1xf32>
    %38 = arith.cmpf ogt, %36, %37 : vector<4x1xf32>
    %39 = vector.shape_cast %38 : vector<4x1xi1> to vector<4x1xi1>
    %40 = vector.broadcast %39 : vector<4x1xi1> to vector<4x32xi1>
    %41 = arith.select %40, %33, %8 : vector<4x32xi1>, vector<4x32xf32>
    %42 = vector.shape_cast %38 : vector<4x1xi1> to vector<4x1xi1>
    %43 = vector.broadcast %42 : vector<4x1xi1> to vector<4x32xi1>
    %44 = arith.select %43, %31, %9 : vector<4x32xi1>, vector<4x32xf32>
    %cst_14 = arith.constant 0.000000e+00 : f32
    %45 = vector.shape_cast %38 : vector<4x1xi1> to vector<4x1xi1>
    %46 = vector.broadcast %45 : vector<4x1xi1> to vector<4x32xi1>
    %47 = vector.broadcast %cst_14 : f32 to vector<4x32xf32>
    %48 = arith.select %46, %33, %47 : vector<4x32xi1>, vector<4x32xf32>
    %49 = vector.extract_strided_slice %48 {offsets = [0, 0], sizes = [2, 32], strides = [1, 1]} : vector<4x32xf32> to vector<2x32xf32>
    %50 = vector.shape_cast %49 : vector<2x32xf32> to vector<2x1x32xf32>
    %c0_15 = arith.constant 0 : index
    %c0_16 = arith.constant 0 : index
    %c0_17 = arith.constant 0 : index
    %51 = vector.load %arg5[%c0_15, %c0_16, %c0_17] : memref<2x8x64xf32, #tpu.memory_space<vmem>>, vector<2x1x32xf32>
    tpu.vector_store %arg5[%c0_15, %c0_16, %c0_17], %50 {strides = array<i32>} : memref<2x8x64xf32, #tpu.memory_space<vmem>>, vector<2x1x32xf32>,
    %52 = vector.extract_strided_slice %48 {offsets = [2, 0], sizes = [2, 32], strides = [1, 1]} : vector<4x32xf32> to vector<2x32xf32>
    %53 = vector.shape_cast %52 : vector<2x32xf32> to vector<2x1x32xf32>
    %c0_18 = arith.constant 0 : index
    %c7 = arith.constant 7 : index
    %c32 = arith.constant 32 : index
    %54 = vector.load %arg5[%c0_18, %c7, %c32] : memref<2x8x64xf32, #tpu.memory_space<vmem>>, vector<2x1x32xf32>
    tpu.vector_store %arg5[%c0_18, %c7, %c32], %53 {strides = array<i32>} : memref<2x8x64xf32, #tpu.memory_space<vmem>>, vector<2x1x32xf32>,
    %cst_19 = arith.constant dense<0.000000e+00> : vector<4x256xf32>
    %55 = tpu.matmul %41, %6, %cst_19 {dimension_numbers = #tpu.dot_dimension_numbers<[1], [0], [0], [1], [0, 0, 1, 1], [], []>} : vector<4x32xf32>, vector<32x256xf32>, vector<4x256xf32> -> vector<4x256xf32>
    %56 = vector.extract_strided_slice %5 {offsets = [2, 0], sizes = [2, 128], strides = [1, 1]} : vector<16x256xf32> to vector<2x128xf32>
    %57 = vector.extract_strided_slice %55 {offsets = [0, 0], sizes = [2, 128], strides = [1, 1]} : vector<4x256xf32> to vector<2x128xf32>
    %58 = arith.addf %56, %57 : vector<2x128xf32>
    %59 = vector.extract_strided_slice %5 {offsets = [12, 128], sizes = [2, 128], strides = [1, 1]} : vector<16x256xf32> to vector<2x128xf32>
    %60 = vector.extract_strided_slice %55 {offsets = [2, 128], sizes = [2, 128], strides = [1, 1]} : vector<4x256xf32> to vector<2x128xf32>
    %61 = arith.addf %59, %60 : vector<2x128xf32>
    %62 = tpu.concatenate %58, %61 in 0 : vector<2x128xf32>, vector<2x128xf32> -> vector<4x128xf32>
    %63 = vector.extract_strided_slice %62 {offsets = [0, 0], sizes = [4, 96], strides = [1, 1]} : vector<4x128xf32> to vector<4x96xf32>
    %64 = arith.negf %63 : vector<4x96xf32>
    %65 = math.exp %64 : vector<4x96xf32>
    %cst_20 = arith.constant 1.000000e+00 : f32
    %66 = vector.broadcast %cst_20 : f32 to vector<4x96xf32>
    %67 = arith.addf %66, %65 : vector<4x96xf32>
    %68 = arith.divf %66, %67 : vector<4x96xf32>
    %69 = vector.extract_strided_slice %62 {offsets = [0, 96], sizes = [4, 32], strides = [1, 1]} : vector<4x128xf32> to vector<4x32xf32>
    %70 = math.tanh %69 : vector<4x32xf32>
    %71 = vector.extract_strided_slice %68 {offsets = [0, 0], sizes = [4, 32], strides = [1, 1]} : vector<4x96xf32> to vector<4x32xf32>
    %72 = vector.extract_strided_slice %68 {offsets = [0, 32], sizes = [4, 32], strides = [1, 1]} : vector<4x96xf32> to vector<4x32xf32>
    %73 = vector.extract_strided_slice %68 {offsets = [0, 64], sizes = [4, 32], strides = [1, 1]} : vector<4x96xf32> to vector<4x32xf32>
    %74 = arith.mulf %72, %44 : vector<4x32xf32>
    %75 = arith.mulf %71, %70 : vector<4x32xf32>
    %76 = arith.addf %74, %75 : vector<4x32xf32>
    %77 = math.tanh %76 : vector<4x32xf32>
    %78 = arith.mulf %73, %77 : vector<4x32xf32>
    %79 = vector.extract_strided_slice %7 {offsets = [2, 0], sizes = [2, 1], strides = [1, 1]} : vector<16x1xf32> to vector<2x1xf32>
    %80 = vector.extract_strided_slice %7 {offsets = [12, 0], sizes = [2, 1], strides = [1, 1]} : vector<16x1xf32> to vector<2x1xf32>
    %81 = tpu.concatenate %79, %80 in 0 : vector<2x1xf32>, vector<2x1xf32> -> vector<4x1xf32>
    %cst_21 = arith.constant 0.000000e+00 : f32
    %82 = vector.broadcast %cst_21 : f32 to vector<4x1xf32>
    %83 = arith.cmpf ogt, %81, %82 : vector<4x1xf32>
    %84 = vector.shape_cast %83 : vector<4x1xi1> to vector<4x1xi1>
    %85 = vector.broadcast %84 : vector<4x1xi1> to vector<4x32xi1>
    %86 = arith.select %85, %78, %41 : vector<4x32xi1>, vector<4x32xf32>
    %87 = vector.shape_cast %83 : vector<4x1xi1> to vector<4x1xi1>
    %88 = vector.broadcast %87 : vector<4x1xi1> to vector<4x32xi1>
    %89 = arith.select %88, %76, %44 : vector<4x32xi1>, vector<4x32xf32>
    %cst_22 = arith.constant 0.000000e+00 : f32
    %90 = vector.shape_cast %83 : vector<4x1xi1> to vector<4x1xi1>
    %91 = vector.broadcast %90 : vector<4x1xi1> to vector<4x32xi1>
    %92 = vector.broadcast %cst_22 : f32 to vector<4x32xf32>
    %93 = arith.select %91, %78, %92 : vector<4x32xi1>, vector<4x32xf32>
    %94 = vector.extract_strided_slice %93 {offsets = [0, 0], sizes = [2, 32], strides = [1, 1]} : vector<4x32xf32> to vector<2x32xf32>
    %95 = vector.shape_cast %94 : vector<2x32xf32> to vector<2x1x32xf32>
    %c0_23 = arith.constant 0 : index
    %c1 = arith.constant 1 : index
    %c0_24 = arith.constant 0 : index
    %96 = vector.load %arg5[%c0_23, %c1, %c0_24] : memref<2x8x64xf32, #tpu.memory_space<vmem>>, vector<2x1x32xf32>
    tpu.vector_store %arg5[%c0_23, %c1, %c0_24], %95 {strides = array<i32>} : memref<2x8x64xf32, #tpu.memory_space<vmem>>, vector<2x1x32xf32>,
    %97 = vector.extract_strided_slice %93 {offsets = [2, 0], sizes = [2, 32], strides = [1, 1]} : vector<4x32xf32> to vector<2x32xf32>
    %98 = vector.shape_cast %97 : vector<2x32xf32> to vector<2x1x32xf32>
    %c0_25 = arith.constant 0 : index
    %c6 = arith.constant 6 : index
    %c32_26 = arith.constant 32 : index
    %99 = vector.load %arg5[%c0_25, %c6, %c32_26] : memref<2x8x64xf32, #tpu.memory_space<vmem>>, vector<2x1x32xf32>
    tpu.vector_store %arg5[%c0_25, %c6, %c32_26], %98 {strides = array<i32>} : memref<2x8x64xf32, #tpu.memory_space<vmem>>, vector<2x1x32xf32>,
    %cst_27 = arith.constant dense<0.000000e+00> : vector<4x256xf32>
    %100 = tpu.matmul %86, %6, %cst_27 {dimension_numbers = #tpu.dot_dimension_numbers<[1], [0], [0], [1], [0, 0, 1, 1], [], []>} : vector<4x32xf32>, vector<32x256xf32>, vector<4x256xf32> -> vector<4x256xf32>
    %101 = vector.extract_strided_slice %5 {offsets = [4, 0], sizes = [2, 128], strides = [1, 1]} : vector<16x256xf32> to vector<2x128xf32>
    %102 = vector.extract_strided_slice %100 {offsets = [0, 0], sizes = [2, 128], strides = [1, 1]} : vector<4x256xf32> to vector<2x128xf32>
    %103 = arith.addf %101, %102 : vector<2x128xf32>
    %104 = vector.extract_strided_slice %5 {offsets = [10, 128], sizes = [2, 128], strides = [1, 1]} : vector<16x256xf32> to vector<2x128xf32>
    %105 = vector.extract_strided_slice %100 {offsets = [2, 128], sizes = [2, 128], strides = [1, 1]} : vector<4x256xf32> to vector<2x128xf32>
    %106 = arith.addf %104, %105 : vector<2x128xf32>
    %107 = tpu.concatenate %103, %106 in 0 : vector<2x128xf32>, vector<2x128xf32> -> vector<4x128xf32>
    %108 = vector.extract_strided_slice %107 {offsets = [0, 0], sizes = [4, 96], strides = [1, 1]} : vector<4x128xf32> to vector<4x96xf32>
    %109 = arith.negf %108 : vector<4x96xf32>
    %110 = math.exp %109 : vector<4x96xf32>
    %cst_28 = arith.constant 1.000000e+00 : f32
    %111 = vector.broadcast %cst_28 : f32 to vector<4x96xf32>
    %112 = arith.addf %111, %110 : vector<4x96xf32>
    %113 = arith.divf %111, %112 : vector<4x96xf32>
    %114 = vector.extract_strided_slice %107 {offsets = [0, 96], sizes = [4, 32], strides = [1, 1]} : vector<4x128xf32> to vector<4x32xf32>
    %115 = math.tanh %114 : vector<4x32xf32>
    %116 = vector.extract_strided_slice %113 {offsets = [0, 0], sizes = [4, 32], strides = [1, 1]} : vector<4x96xf32> to vector<4x32xf32>
    %117 = vector.extract_strided_slice %113 {offsets = [0, 32], sizes = [4, 32], strides = [1, 1]} : vector<4x96xf32> to vector<4x32xf32>
    %118 = vector.extract_strided_slice %113 {offsets = [0, 64], sizes = [4, 32], strides = [1, 1]} : vector<4x96xf32> to vector<4x32xf32>
    %119 = arith.mulf %117, %89 : vector<4x32xf32>
    %120 = arith.mulf %116, %115 : vector<4x32xf32>
    %121 = arith.addf %119, %120 : vector<4x32xf32>
    %122 = math.tanh %121 : vector<4x32xf32>
    %123 = arith.mulf %118, %122 : vector<4x32xf32>
    %124 = vector.extract_strided_slice %7 {offsets = [4, 0], sizes = [2, 1], strides = [1, 1]} : vector<16x1xf32> to vector<2x1xf32>
    %125 = vector.extract_strided_slice %7 {offsets = [10, 0], sizes = [2, 1], strides = [1, 1]} : vector<16x1xf32> to vector<2x1xf32>
    %126 = tpu.concatenate %124, %125 in 0 : vector<2x1xf32>, vector<2x1xf32> -> vector<4x1xf32>
    %cst_29 = arith.constant 0.000000e+00 : f32
    %127 = vector.broadcast %cst_29 : f32 to vector<4x1xf32>
    %128 = arith.cmpf ogt, %126, %127 : vector<4x1xf32>
    %129 = vector.shape_cast %128 : vector<4x1xi1> to vector<4x1xi1>
    %130 = vector.broadcast %129 : vector<4x1xi1> to vector<4x32xi1>
    %131 = arith.select %130, %123, %86 : vector<4x32xi1>, vector<4x32xf32>
    %132 = vector.shape_cast %128 : vector<4x1xi1> to vector<4x1xi1>
    %133 = vector.broadcast %132 : vector<4x1xi1> to vector<4x32xi1>
    %134 = arith.select %133, %121, %89 : vector<4x32xi1>, vector<4x32xf32>
    %cst_30 = arith.constant 0.000000e+00 : f32
    %135 = vector.shape_cast %128 : vector<4x1xi1> to vector<4x1xi1>
    %136 = vector.broadcast %135 : vector<4x1xi1> to vector<4x32xi1>
    %137 = vector.broadcast %cst_30 : f32 to vector<4x32xf32>
    %138 = arith.select %136, %123, %137 : vector<4x32xi1>, vector<4x32xf32>
    %139 = vector.extract_strided_slice %138 {offsets = [0, 0], sizes = [2, 32], strides = [1, 1]} : vector<4x32xf32> to vector<2x32xf32>
    %140 = vector.shape_cast %139 : vector<2x32xf32> to vector<2x1x32xf32>
    %c0_31 = arith.constant 0 : index
    %c2 = arith.constant 2 : index
    %c0_32 = arith.constant 0 : index
    %141 = vector.load %arg5[%c0_31, %c2, %c0_32] : memref<2x8x64xf32, #tpu.memory_space<vmem>>, vector<2x1x32xf32>
    tpu.vector_store %arg5[%c0_31, %c2, %c0_32], %140 {strides = array<i32>} : memref<2x8x64xf32, #tpu.memory_space<vmem>>, vector<2x1x32xf32>,
    %142 = vector.extract_strided_slice %138 {offsets = [2, 0], sizes = [2, 32], strides = [1, 1]} : vector<4x32xf32> to vector<2x32xf32>
    %143 = vector.shape_cast %142 : vector<2x32xf32> to vector<2x1x32xf32>
    %c0_33 = arith.constant 0 : index
    %c5 = arith.constant 5 : index
    %c32_34 = arith.constant 32 : index
    %144 = vector.load %arg5[%c0_33, %c5, %c32_34] : memref<2x8x64xf32, #tpu.memory_space<vmem>>, vector<2x1x32xf32>
    tpu.vector_store %arg5[%c0_33, %c5, %c32_34], %143 {strides = array<i32>} : memref<2x8x64xf32, #tpu.memory_space<vmem>>, vector<2x1x32xf32>,
    %cst_35 = arith.constant dense<0.000000e+00> : vector<4x256xf32>
    %145 = tpu.matmul %131, %6, %cst_35 {dimension_numbers = #tpu.dot_dimension_numbers<[1], [0], [0], [1], [0, 0, 1, 1], [], []>} : vector<4x32xf32>, vector<32x256xf32>, vector<4x256xf32> -> vector<4x256xf32>
    %146 = vector.extract_strided_slice %5 {offsets = [6, 0], sizes = [2, 128], strides = [1, 1]} : vector<16x256xf32> to vector<2x128xf32>
    %147 = vector.extract_strided_slice %145 {offsets = [0, 0], sizes = [2, 128], strides = [1, 1]} : vector<4x256xf32> to vector<2x128xf32>
    %148 = arith.addf %146, %147 : vector<2x128xf32>
    %149 = vector.extract_strided_slice %5 {offsets = [8, 128], sizes = [2, 128], strides = [1, 1]} : vector<16x256xf32> to vector<2x128xf32>
    %150 = vector.extract_strided_slice %145 {offsets = [2, 128], sizes = [2, 128], strides = [1, 1]} : vector<4x256xf32> to vector<2x128xf32>
    %151 = arith.addf %149, %150 : vector<2x128xf32>
    %152 = tpu.concatenate %148, %151 in 0 : vector<2x128xf32>, vector<2x128xf32> -> vector<4x128xf32>
    %153 = vector.extract_strided_slice %152 {offsets = [0, 0], sizes = [4, 96], strides = [1, 1]} : vector<4x128xf32> to vector<4x96xf32>
    %154 = arith.negf %153 : vector<4x96xf32>
    %155 = math.exp %154 : vector<4x96xf32>
    %cst_36 = arith.constant 1.000000e+00 : f32
    %156 = vector.broadcast %cst_36 : f32 to vector<4x96xf32>
    %157 = arith.addf %156, %155 : vector<4x96xf32>
    %158 = arith.divf %156, %157 : vector<4x96xf32>
    %159 = vector.extract_strided_slice %152 {offsets = [0, 96], sizes = [4, 32], strides = [1, 1]} : vector<4x128xf32> to vector<4x32xf32>
    %160 = math.tanh %159 : vector<4x32xf32>
    %161 = vector.extract_strided_slice %158 {offsets = [0, 0], sizes = [4, 32], strides = [1, 1]} : vector<4x96xf32> to vector<4x32xf32>
    %162 = vector.extract_strided_slice %158 {offsets = [0, 32], sizes = [4, 32], strides = [1, 1]} : vector<4x96xf32> to vector<4x32xf32>
    %163 = vector.extract_strided_slice %158 {offsets = [0, 64], sizes = [4, 32], strides = [1, 1]} : vector<4x96xf32> to vector<4x32xf32>
    %164 = arith.mulf %162, %134 : vector<4x32xf32>
    %165 = arith.mulf %161, %160 : vector<4x32xf32>
    %166 = arith.addf %164, %165 : vector<4x32xf32>
    %167 = math.tanh %166 : vector<4x32xf32>
    %168 = arith.mulf %163, %167 : vector<4x32xf32>
    %169 = vector.extract_strided_slice %7 {offsets = [6, 0], sizes = [2, 1], strides = [1, 1]} : vector<16x1xf32> to vector<2x1xf32>
    %170 = vector.extract_strided_slice %7 {offsets = [8, 0], sizes = [2, 1], strides = [1, 1]} : vector<16x1xf32> to vector<2x1xf32>
    %171 = tpu.concatenate %169, %170 in 0 : vector<2x1xf32>, vector<2x1xf32> -> vector<4x1xf32>
    %cst_37 = arith.constant 0.000000e+00 : f32
    %172 = vector.broadcast %cst_37 : f32 to vector<4x1xf32>
    %173 = arith.cmpf ogt, %171, %172 : vector<4x1xf32>
    %174 = vector.shape_cast %173 : vector<4x1xi1> to vector<4x1xi1>
    %175 = vector.broadcast %174 : vector<4x1xi1> to vector<4x32xi1>
    %176 = arith.select %175, %168, %131 : vector<4x32xi1>, vector<4x32xf32>
    %177 = vector.shape_cast %173 : vector<4x1xi1> to vector<4x1xi1>
    %178 = vector.broadcast %177 : vector<4x1xi1> to vector<4x32xi1>
    %179 = arith.select %178, %166, %134 : vector<4x32xi1>, vector<4x32xf32>
    %cst_38 = arith.constant 0.000000e+00 : f32
    %180 = vector.shape_cast %173 : vector<4x1xi1> to vector<4x1xi1>
    %181 = vector.broadcast %180 : vector<4x1xi1> to vector<4x32xi1>
    %182 = vector.broadcast %cst_38 : f32 to vector<4x32xf32>
    %183 = arith.select %181, %168, %182 : vector<4x32xi1>, vector<4x32xf32>
    %184 = vector.extract_strided_slice %183 {offsets = [0, 0], sizes = [2, 32], strides = [1, 1]} : vector<4x32xf32> to vector<2x32xf32>
    %185 = vector.shape_cast %184 : vector<2x32xf32> to vector<2x1x32xf32>
    %c0_39 = arith.constant 0 : index
    %c3 = arith.constant 3 : index
    %c0_40 = arith.constant 0 : index
    %186 = vector.load %arg5[%c0_39, %c3, %c0_40] : memref<2x8x64xf32, #tpu.memory_space<vmem>>, vector<2x1x32xf32>
    tpu.vector_store %arg5[%c0_39, %c3, %c0_40], %185 {strides = array<i32>} : memref<2x8x64xf32, #tpu.memory_space<vmem>>, vector<2x1x32xf32>,
    %187 = vector.extract_strided_slice %183 {offsets = [2, 0], sizes = [2, 32], strides = [1, 1]} : vector<4x32xf32> to vector<2x32xf32>
    %188 = vector.shape_cast %187 : vector<2x32xf32> to vector<2x1x32xf32>
    %c0_41 = arith.constant 0 : index
    %c4 = arith.constant 4 : index
    %c32_42 = arith.constant 32 : index
    %189 = vector.load %arg5[%c0_41, %c4, %c32_42] : memref<2x8x64xf32, #tpu.memory_space<vmem>>, vector<2x1x32xf32>
    tpu.vector_store %arg5[%c0_41, %c4, %c32_42], %188 {strides = array<i32>} : memref<2x8x64xf32, #tpu.memory_space<vmem>>, vector<2x1x32xf32>,
    %cst_43 = arith.constant dense<0.000000e+00> : vector<4x256xf32>
    %190 = tpu.matmul %176, %6, %cst_43 {dimension_numbers = #tpu.dot_dimension_numbers<[1], [0], [0], [1], [0, 0, 1, 1], [], []>} : vector<4x32xf32>, vector<32x256xf32>, vector<4x256xf32> -> vector<4x256xf32>
    %191 = vector.extract_strided_slice %5 {offsets = [8, 0], sizes = [2, 128], strides = [1, 1]} : vector<16x256xf32> to vector<2x128xf32>
    %192 = vector.extract_strided_slice %190 {offsets = [0, 0], sizes = [2, 128], strides = [1, 1]} : vector<4x256xf32> to vector<2x128xf32>
    %193 = arith.addf %191, %192 : vector<2x128xf32>
    %194 = vector.extract_strided_slice %5 {offsets = [6, 128], sizes = [2, 128], strides = [1, 1]} : vector<16x256xf32> to vector<2x128xf32>
    %195 = vector.extract_strided_slice %190 {offsets = [2, 128], sizes = [2, 128], strides = [1, 1]} : vector<4x256xf32> to vector<2x128xf32>
    %196 = arith.addf %194, %195 : vector<2x128xf32>
    %197 = tpu.concatenate %193, %196 in 0 : vector<2x128xf32>, vector<2x128xf32> -> vector<4x128xf32>
    %198 = vector.extract_strided_slice %197 {offsets = [0, 0], sizes = [4, 96], strides = [1, 1]} : vector<4x128xf32> to vector<4x96xf32>
    %199 = arith.negf %198 : vector<4x96xf32>
    %200 = math.exp %199 : vector<4x96xf32>
    %cst_44 = arith.constant 1.000000e+00 : f32
    %201 = vector.broadcast %cst_44 : f32 to vector<4x96xf32>
    %202 = arith.addf %201, %200 : vector<4x96xf32>
    %203 = arith.divf %201, %202 : vector<4x96xf32>
    %204 = vector.extract_strided_slice %197 {offsets = [0, 96], sizes = [4, 32], strides = [1, 1]} : vector<4x128xf32> to vector<4x32xf32>
    %205 = math.tanh %204 : vector<4x32xf32>
    %206 = vector.extract_strided_slice %203 {offsets = [0, 0], sizes = [4, 32], strides = [1, 1]} : vector<4x96xf32> to vector<4x32xf32>
    %207 = vector.extract_strided_slice %203 {offsets = [0, 32], sizes = [4, 32], strides = [1, 1]} : vector<4x96xf32> to vector<4x32xf32>
    %208 = vector.extract_strided_slice %203 {offsets = [0, 64], sizes = [4, 32], strides = [1, 1]} : vector<4x96xf32> to vector<4x32xf32>
    %209 = arith.mulf %207, %179 : vector<4x32xf32>
    %210 = arith.mulf %206, %205 : vector<4x32xf32>
    %211 = arith.addf %209, %210 : vector<4x32xf32>
    %212 = math.tanh %211 : vector<4x32xf32>
    %213 = arith.mulf %208, %212 : vector<4x32xf32>
    %214 = vector.extract_strided_slice %7 {offsets = [8, 0], sizes = [2, 1], strides = [1, 1]} : vector<16x1xf32> to vector<2x1xf32>
    %215 = vector.extract_strided_slice %7 {offsets = [6, 0], sizes = [2, 1], strides = [1, 1]} : vector<16x1xf32> to vector<2x1xf32>
    %216 = tpu.concatenate %214, %215 in 0 : vector<2x1xf32>, vector<2x1xf32> -> vector<4x1xf32>
    %cst_45 = arith.constant 0.000000e+00 : f32
    %217 = vector.broadcast %cst_45 : f32 to vector<4x1xf32>
    %218 = arith.cmpf ogt, %216, %217 : vector<4x1xf32>
    %219 = vector.shape_cast %218 : vector<4x1xi1> to vector<4x1xi1>
    %220 = vector.broadcast %219 : vector<4x1xi1> to vector<4x32xi1>
    %221 = arith.select %220, %213, %176 : vector<4x32xi1>, vector<4x32xf32>
    %222 = vector.shape_cast %218 : vector<4x1xi1> to vector<4x1xi1>
    %223 = vector.broadcast %222 : vector<4x1xi1> to vector<4x32xi1>
    %224 = arith.select %223, %211, %179 : vector<4x32xi1>, vector<4x32xf32>
    %cst_46 = arith.constant 0.000000e+00 : f32
    %225 = vector.shape_cast %218 : vector<4x1xi1> to vector<4x1xi1>
    %226 = vector.broadcast %225 : vector<4x1xi1> to vector<4x32xi1>
    %227 = vector.broadcast %cst_46 : f32 to vector<4x32xf32>
    %228 = arith.select %226, %213, %227 : vector<4x32xi1>, vector<4x32xf32>
    %229 = vector.extract_strided_slice %228 {offsets = [0, 0], sizes = [2, 32], strides = [1, 1]} : vector<4x32xf32> to vector<2x32xf32>
    %230 = vector.shape_cast %229 : vector<2x32xf32> to vector<2x1x32xf32>
    %c0_47 = arith.constant 0 : index
    %c4_48 = arith.constant 4 : index
    %c0_49 = arith.constant 0 : index
    %231 = vector.load %arg5[%c0_47, %c4_48, %c0_49] : memref<2x8x64xf32, #tpu.memory_space<vmem>>, vector<2x1x32xf32>
    tpu.vector_store %arg5[%c0_47, %c4_48, %c0_49], %230 {strides = array<i32>} : memref<2x8x64xf32, #tpu.memory_space<vmem>>, vector<2x1x32xf32>,
    %232 = vector.extract_strided_slice %228 {offsets = [2, 0], sizes = [2, 32], strides = [1, 1]} : vector<4x32xf32> to vector<2x32xf32>
    %233 = vector.shape_cast %232 : vector<2x32xf32> to vector<2x1x32xf32>
    %c0_50 = arith.constant 0 : index
    %c3_51 = arith.constant 3 : index
    %c32_52 = arith.constant 32 : index
    %234 = vector.load %arg5[%c0_50, %c3_51, %c32_52] : memref<2x8x64xf32, #tpu.memory_space<vmem>>, vector<2x1x32xf32>
    tpu.vector_store %arg5[%c0_50, %c3_51, %c32_52], %233 {strides = array<i32>} : memref<2x8x64xf32, #tpu.memory_space<vmem>>, vector<2x1x32xf32>,
    %cst_53 = arith.constant dense<0.000000e+00> : vector<4x256xf32>
    %235 = tpu.matmul %221, %6, %cst_53 {dimension_numbers = #tpu.dot_dimension_numbers<[1], [0], [0], [1], [0, 0, 1, 1], [], []>} : vector<4x32xf32>, vector<32x256xf32>, vector<4x256xf32> -> vector<4x256xf32>
    %236 = vector.extract_strided_slice %5 {offsets = [10, 0], sizes = [2, 128], strides = [1, 1]} : vector<16x256xf32> to vector<2x128xf32>
    %237 = vector.extract_strided_slice %235 {offsets = [0, 0], sizes = [2, 128], strides = [1, 1]} : vector<4x256xf32> to vector<2x128xf32>
    %238 = arith.addf %236, %237 : vector<2x128xf32>
    %239 = vector.extract_strided_slice %5 {offsets = [4, 128], sizes = [2, 128], strides = [1, 1]} : vector<16x256xf32> to vector<2x128xf32>
    %240 = vector.extract_strided_slice %235 {offsets = [2, 128], sizes = [2, 128], strides = [1, 1]} : vector<4x256xf32> to vector<2x128xf32>
    %241 = arith.addf %239, %240 : vector<2x128xf32>
    %242 = tpu.concatenate %238, %241 in 0 : vector<2x128xf32>, vector<2x128xf32> -> vector<4x128xf32>
    %243 = vector.extract_strided_slice %242 {offsets = [0, 0], sizes = [4, 96], strides = [1, 1]} : vector<4x128xf32> to vector<4x96xf32>
    %244 = arith.negf %243 : vector<4x96xf32>
    %245 = math.exp %244 : vector<4x96xf32>
    %cst_54 = arith.constant 1.000000e+00 : f32
    %246 = vector.broadcast %cst_54 : f32 to vector<4x96xf32>
    %247 = arith.addf %246, %245 : vector<4x96xf32>
    %248 = arith.divf %246, %247 : vector<4x96xf32>
    %249 = vector.extract_strided_slice %242 {offsets = [0, 96], sizes = [4, 32], strides = [1, 1]} : vector<4x128xf32> to vector<4x32xf32>
    %250 = math.tanh %249 : vector<4x32xf32>
    %251 = vector.extract_strided_slice %248 {offsets = [0, 0], sizes = [4, 32], strides = [1, 1]} : vector<4x96xf32> to vector<4x32xf32>
    %252 = vector.extract_strided_slice %248 {offsets = [0, 32], sizes = [4, 32], strides = [1, 1]} : vector<4x96xf32> to vector<4x32xf32>
    %253 = vector.extract_strided_slice %248 {offsets = [0, 64], sizes = [4, 32], strides = [1, 1]} : vector<4x96xf32> to vector<4x32xf32>
    %254 = arith.mulf %252, %224 : vector<4x32xf32>
    %255 = arith.mulf %251, %250 : vector<4x32xf32>
    %256 = arith.addf %254, %255 : vector<4x32xf32>
    %257 = math.tanh %256 : vector<4x32xf32>
    %258 = arith.mulf %253, %257 : vector<4x32xf32>
    %259 = vector.extract_strided_slice %7 {offsets = [10, 0], sizes = [2, 1], strides = [1, 1]} : vector<16x1xf32> to vector<2x1xf32>
    %260 = vector.extract_strided_slice %7 {offsets = [4, 0], sizes = [2, 1], strides = [1, 1]} : vector<16x1xf32> to vector<2x1xf32>
    %261 = tpu.concatenate %259, %260 in 0 : vector<2x1xf32>, vector<2x1xf32> -> vector<4x1xf32>
    %cst_55 = arith.constant 0.000000e+00 : f32
    %262 = vector.broadcast %cst_55 : f32 to vector<4x1xf32>
    %263 = arith.cmpf ogt, %261, %262 : vector<4x1xf32>
    %264 = vector.shape_cast %263 : vector<4x1xi1> to vector<4x1xi1>
    %265 = vector.broadcast %264 : vector<4x1xi1> to vector<4x32xi1>
    %266 = arith.select %265, %258, %221 : vector<4x32xi1>, vector<4x32xf32>
    %267 = vector.shape_cast %263 : vector<4x1xi1> to vector<4x1xi1>
    %268 = vector.broadcast %267 : vector<4x1xi1> to vector<4x32xi1>
    %269 = arith.select %268, %256, %224 : vector<4x32xi1>, vector<4x32xf32>
    %cst_56 = arith.constant 0.000000e+00 : f32
    %270 = vector.shape_cast %263 : vector<4x1xi1> to vector<4x1xi1>
    %271 = vector.broadcast %270 : vector<4x1xi1> to vector<4x32xi1>
    %272 = vector.broadcast %cst_56 : f32 to vector<4x32xf32>
    %273 = arith.select %271, %258, %272 : vector<4x32xi1>, vector<4x32xf32>
    %274 = vector.extract_strided_slice %273 {offsets = [0, 0], sizes = [2, 32], strides = [1, 1]} : vector<4x32xf32> to vector<2x32xf32>
    %275 = vector.shape_cast %274 : vector<2x32xf32> to vector<2x1x32xf32>
    %c0_57 = arith.constant 0 : index
    %c5_58 = arith.constant 5 : index
    %c0_59 = arith.constant 0 : index
    %276 = vector.load %arg5[%c0_57, %c5_58, %c0_59] : memref<2x8x64xf32, #tpu.memory_space<vmem>>, vector<2x1x32xf32>
    tpu.vector_store %arg5[%c0_57, %c5_58, %c0_59], %275 {strides = array<i32>} : memref<2x8x64xf32, #tpu.memory_space<vmem>>, vector<2x1x32xf32>,
    %277 = vector.extract_strided_slice %273 {offsets = [2, 0], sizes = [2, 32], strides = [1, 1]} : vector<4x32xf32> to vector<2x32xf32>
    %278 = vector.shape_cast %277 : vector<2x32xf32> to vector<2x1x32xf32>
    %c0_60 = arith.constant 0 : index
    %c2_61 = arith.constant 2 : index
    %c32_62 = arith.constant 32 : index
    %279 = vector.load %arg5[%c0_60, %c2_61, %c32_62] : memref<2x8x64xf32, #tpu.memory_space<vmem>>, vector<2x1x32xf32>
    tpu.vector_store %arg5[%c0_60, %c2_61, %c32_62], %278 {strides = array<i32>} : memref<2x8x64xf32, #tpu.memory_space<vmem>>, vector<2x1x32xf32>,
    %cst_63 = arith.constant dense<0.000000e+00> : vector<4x256xf32>
    %280 = tpu.matmul %266, %6, %cst_63 {dimension_numbers = #tpu.dot_dimension_numbers<[1], [0], [0], [1], [0, 0, 1, 1], [], []>} : vector<4x32xf32>, vector<32x256xf32>, vector<4x256xf32> -> vector<4x256xf32>
    %281 = vector.extract_strided_slice %5 {offsets = [12, 0], sizes = [2, 128], strides = [1, 1]} : vector<16x256xf32> to vector<2x128xf32>
    %282 = vector.extract_strided_slice %280 {offsets = [0, 0], sizes = [2, 128], strides = [1, 1]} : vector<4x256xf32> to vector<2x128xf32>
    %283 = arith.addf %281, %282 : vector<2x128xf32>
    %284 = vector.extract_strided_slice %5 {offsets = [2, 128], sizes = [2, 128], strides = [1, 1]} : vector<16x256xf32> to vector<2x128xf32>
    %285 = vector.extract_strided_slice %280 {offsets = [2, 128], sizes = [2, 128], strides = [1, 1]} : vector<4x256xf32> to vector<2x128xf32>
    %286 = arith.addf %284, %285 : vector<2x128xf32>
    %287 = tpu.concatenate %283, %286 in 0 : vector<2x128xf32>, vector<2x128xf32> -> vector<4x128xf32>
    %288 = vector.extract_strided_slice %287 {offsets = [0, 0], sizes = [4, 96], strides = [1, 1]} : vector<4x128xf32> to vector<4x96xf32>
    %289 = arith.negf %288 : vector<4x96xf32>
    %290 = math.exp %289 : vector<4x96xf32>
    %cst_64 = arith.constant 1.000000e+00 : f32
    %291 = vector.broadcast %cst_64 : f32 to vector<4x96xf32>
    %292 = arith.addf %291, %290 : vector<4x96xf32>
    %293 = arith.divf %291, %292 : vector<4x96xf32>
    %294 = vector.extract_strided_slice %287 {offsets = [0, 96], sizes = [4, 32], strides = [1, 1]} : vector<4x128xf32> to vector<4x32xf32>
    %295 = math.tanh %294 : vector<4x32xf32>
    %296 = vector.extract_strided_slice %293 {offsets = [0, 0], sizes = [4, 32], strides = [1, 1]} : vector<4x96xf32> to vector<4x32xf32>
    %297 = vector.extract_strided_slice %293 {offsets = [0, 32], sizes = [4, 32], strides = [1, 1]} : vector<4x96xf32> to vector<4x32xf32>
    %298 = vector.extract_strided_slice %293 {offsets = [0, 64], sizes = [4, 32], strides = [1, 1]} : vector<4x96xf32> to vector<4x32xf32>
    %299 = arith.mulf %297, %269 : vector<4x32xf32>
    %300 = arith.mulf %296, %295 : vector<4x32xf32>
    %301 = arith.addf %299, %300 : vector<4x32xf32>
    %302 = math.tanh %301 : vector<4x32xf32>
    %303 = arith.mulf %298, %302 : vector<4x32xf32>
    %304 = vector.extract_strided_slice %7 {offsets = [12, 0], sizes = [2, 1], strides = [1, 1]} : vector<16x1xf32> to vector<2x1xf32>
    %305 = vector.extract_strided_slice %7 {offsets = [2, 0], sizes = [2, 1], strides = [1, 1]} : vector<16x1xf32> to vector<2x1xf32>
    %306 = tpu.concatenate %304, %305 in 0 : vector<2x1xf32>, vector<2x1xf32> -> vector<4x1xf32>
    %cst_65 = arith.constant 0.000000e+00 : f32
    %307 = vector.broadcast %cst_65 : f32 to vector<4x1xf32>
    %308 = arith.cmpf ogt, %306, %307 : vector<4x1xf32>
    %309 = vector.shape_cast %308 : vector<4x1xi1> to vector<4x1xi1>
    %310 = vector.broadcast %309 : vector<4x1xi1> to vector<4x32xi1>
    %311 = arith.select %310, %303, %266 : vector<4x32xi1>, vector<4x32xf32>
    %312 = vector.shape_cast %308 : vector<4x1xi1> to vector<4x1xi1>
    %313 = vector.broadcast %312 : vector<4x1xi1> to vector<4x32xi1>
    %314 = arith.select %313, %301, %269 : vector<4x32xi1>, vector<4x32xf32>
    %cst_66 = arith.constant 0.000000e+00 : f32
    %315 = vector.shape_cast %308 : vector<4x1xi1> to vector<4x1xi1>
    %316 = vector.broadcast %315 : vector<4x1xi1> to vector<4x32xi1>
    %317 = vector.broadcast %cst_66 : f32 to vector<4x32xf32>
    %318 = arith.select %316, %303, %317 : vector<4x32xi1>, vector<4x32xf32>
    %319 = vector.extract_strided_slice %318 {offsets = [0, 0], sizes = [2, 32], strides = [1, 1]} : vector<4x32xf32> to vector<2x32xf32>
    %320 = vector.shape_cast %319 : vector<2x32xf32> to vector<2x1x32xf32>
    %c0_67 = arith.constant 0 : index
    %c6_68 = arith.constant 6 : index
    %c0_69 = arith.constant 0 : index
    %321 = vector.load %arg5[%c0_67, %c6_68, %c0_69] : memref<2x8x64xf32, #tpu.memory_space<vmem>>, vector<2x1x32xf32>
    tpu.vector_store %arg5[%c0_67, %c6_68, %c0_69], %320 {strides = array<i32>} : memref<2x8x64xf32, #tpu.memory_space<vmem>>, vector<2x1x32xf32>,
    %322 = vector.extract_strided_slice %318 {offsets = [2, 0], sizes = [2, 32], strides = [1, 1]} : vector<4x32xf32> to vector<2x32xf32>
    %323 = vector.shape_cast %322 : vector<2x32xf32> to vector<2x1x32xf32>
    %c0_70 = arith.constant 0 : index
    %c1_71 = arith.constant 1 : index
    %c32_72 = arith.constant 32 : index
    %324 = vector.load %arg5[%c0_70, %c1_71, %c32_72] : memref<2x8x64xf32, #tpu.memory_space<vmem>>, vector<2x1x32xf32>
    tpu.vector_store %arg5[%c0_70, %c1_71, %c32_72], %323 {strides = array<i32>} : memref<2x8x64xf32, #tpu.memory_space<vmem>>, vector<2x1x32xf32>,
    %cst_73 = arith.constant dense<0.000000e+00> : vector<4x256xf32>
    %325 = tpu.matmul %311, %6, %cst_73 {dimension_numbers = #tpu.dot_dimension_numbers<[1], [0], [0], [1], [0, 0, 1, 1], [], []>} : vector<4x32xf32>, vector<32x256xf32>, vector<4x256xf32> -> vector<4x256xf32>
    %326 = vector.extract_strided_slice %5 {offsets = [14, 0], sizes = [2, 128], strides = [1, 1]} : vector<16x256xf32> to vector<2x128xf32>
    %327 = vector.extract_strided_slice %325 {offsets = [0, 0], sizes = [2, 128], strides = [1, 1]} : vector<4x256xf32> to vector<2x128xf32>
    %328 = arith.addf %326, %327 : vector<2x128xf32>
    %329 = vector.extract_strided_slice %5 {offsets = [0, 128], sizes = [2, 128], strides = [1, 1]} : vector<16x256xf32> to vector<2x128xf32>
    %330 = vector.extract_strided_slice %325 {offsets = [2, 128], sizes = [2, 128], strides = [1, 1]} : vector<4x256xf32> to vector<2x128xf32>
    %331 = arith.addf %329, %330 : vector<2x128xf32>
    %332 = tpu.concatenate %328, %331 in 0 : vector<2x128xf32>, vector<2x128xf32> -> vector<4x128xf32>
    %333 = vector.extract_strided_slice %332 {offsets = [0, 0], sizes = [4, 96], strides = [1, 1]} : vector<4x128xf32> to vector<4x96xf32>
    %334 = arith.negf %333 : vector<4x96xf32>
    %335 = math.exp %334 : vector<4x96xf32>
    %cst_74 = arith.constant 1.000000e+00 : f32
    %336 = vector.broadcast %cst_74 : f32 to vector<4x96xf32>
    %337 = arith.addf %336, %335 : vector<4x96xf32>
    %338 = arith.divf %336, %337 : vector<4x96xf32>
    %339 = vector.extract_strided_slice %332 {offsets = [0, 96], sizes = [4, 32], strides = [1, 1]} : vector<4x128xf32> to vector<4x32xf32>
    %340 = math.tanh %339 : vector<4x32xf32>
    %341 = vector.extract_strided_slice %338 {offsets = [0, 0], sizes = [4, 32], strides = [1, 1]} : vector<4x96xf32> to vector<4x32xf32>
    %342 = vector.extract_strided_slice %338 {offsets = [0, 32], sizes = [4, 32], strides = [1, 1]} : vector<4x96xf32> to vector<4x32xf32>
    %343 = vector.extract_strided_slice %338 {offsets = [0, 64], sizes = [4, 32], strides = [1, 1]} : vector<4x96xf32> to vector<4x32xf32>
    %344 = arith.mulf %342, %314 : vector<4x32xf32>
    %345 = arith.mulf %341, %340 : vector<4x32xf32>
    %346 = arith.addf %344, %345 : vector<4x32xf32>
    %347 = math.tanh %346 : vector<4x32xf32>
    %348 = arith.mulf %343, %347 : vector<4x32xf32>
    %349 = vector.extract_strided_slice %7 {offsets = [14, 0], sizes = [2, 1], strides = [1, 1]} : vector<16x1xf32> to vector<2x1xf32>
    %350 = vector.extract_strided_slice %7 {offsets = [0, 0], sizes = [2, 1], strides = [1, 1]} : vector<16x1xf32> to vector<2x1xf32>
    %351 = tpu.concatenate %349, %350 in 0 : vector<2x1xf32>, vector<2x1xf32> -> vector<4x1xf32>
    %cst_75 = arith.constant 0.000000e+00 : f32
    %352 = vector.broadcast %cst_75 : f32 to vector<4x1xf32>
    %353 = arith.cmpf ogt, %351, %352 : vector<4x1xf32>
    %cst_76 = arith.constant 0.000000e+00 : f32
    %354 = vector.shape_cast %353 : vector<4x1xi1> to vector<4x1xi1>
    %355 = vector.broadcast %354 : vector<4x1xi1> to vector<4x32xi1>
    %356 = vector.broadcast %cst_76 : f32 to vector<4x32xf32>
    %357 = arith.select %355, %348, %356 : vector<4x32xi1>, vector<4x32xf32>
    %358 = vector.extract_strided_slice %357 {offsets = [0, 0], sizes = [2, 32], strides = [1, 1]} : vector<4x32xf32> to vector<2x32xf32>
    %359 = vector.shape_cast %358 : vector<2x32xf32> to vector<2x1x32xf32>
    %c0_77 = arith.constant 0 : index
    %c7_78 = arith.constant 7 : index
    %c0_79 = arith.constant 0 : index
    %360 = vector.load %arg5[%c0_77, %c7_78, %c0_79] : memref<2x8x64xf32, #tpu.memory_space<vmem>>, vector<2x1x32xf32>
    tpu.vector_store %arg5[%c0_77, %c7_78, %c0_79], %359 {strides = array<i32>} : memref<2x8x64xf32, #tpu.memory_space<vmem>>, vector<2x1x32xf32>,
    %361 = vector.extract_strided_slice %357 {offsets = [2, 0], sizes = [2, 32], strides = [1, 1]} : vector<4x32xf32> to vector<2x32xf32>
    %362 = vector.shape_cast %361 : vector<2x32xf32> to vector<2x1x32xf32>
    %c0_80 = arith.constant 0 : index
    %c0_81 = arith.constant 0 : index
    %c32_82 = arith.constant 32 : index
    %363 = vector.load %arg5[%c0_80, %c0_81, %c32_82] : memref<2x8x64xf32, #tpu.memory_space<vmem>>, vector<2x1x32xf32>
    tpu.vector_store %arg5[%c0_80, %c0_81, %c32_82], %362 {strides = array<i32>} : memref<2x8x64xf32, #tpu.memory_space<vmem>>, vector<2x1x32xf32>,
    return
  }
}

</mosaic_0001>

<bundles_post_ra>
// kernel: forward.3
= control target key start
LH: loop header
LB: loop body
LE: loop exit
PB: predicated region body
PF: predicated region fallthrough
CT: control target
= control target key end

     0   :  { %s586_s0 = inlined_call_operand.vmem [shape: f32[2,8,64], index: 0, kind: input, shape index: {}]   ;;  %s587_s1 = inlined_call_operand.vmem [shape: f32[2,8], index: 1, kind: input, shape index: {}]   ;;  %s588_s2 = inlined_call_operand.vmem [shape: f32[64,32], index: 2, kind: input, shape index: {}]   ;;  %s589_s3 = inlined_call_operand.vmem [shape: f32[1,32], index: 3, kind: input, shape index: {}]   ;;  %s590_s4 = inlined_call_operand.vmem [shape: f32[32,1], index: 4, kind: input, shape index: {}]   ;;  %s591_s5 = inlined_call_operand.vmem [shape: f32[64,32], index: 5, kind: input, shape index: {}]   ;;  %s592_s6 = inlined_call_operand.vmem [shape: f32[1,32], index: 6, kind: input, shape index: {}]   ;;  %s593_s7 = inlined_call_operand.vmem [shape: f32[32,128], index: 7, kind: input, shape index: {}]   ;;  %s594_s8 = inlined_call_operand.vmem [shape: f32[1,128], index: 8, kind: input, shape index: {}]   ;;  %s595_s9 = inlined_call_operand.vmem [shape: f32[64,128], index: 9, kind: input, shape index: {}]   ;;  %s596_s10 = inlined_call_operand.vmem [shape: f32[1,128], index: 10, kind: input, shape index: {}]   ;;  %s597_s11 = inlined_call_operand.hbm [shape: f32[2,128], index: 11, kind: output, shape index: {0}]   ;;  %s598_s12 = inlined_call_operand.vmem [shape: f32[16,128], index: 12, kind: output, shape index: {1}]  }
   0x1   :  { %v50_v0 = vld [vmem:[%s588_s2 + $0x38] sm:$0xff]  ;;  %v49_v1 = vld [vmem:[%s588_s2 + $0x30] sm:$0xff]  ;;  %v48_v2 = vld [vmem:[%s588_s2 + $0x28] sm:$0xff] }
   0x2   :  { %70 = vmatpush.msra.mxu0 %v50_v0  ;;  %v47_v3 = vld [vmem:[%s588_s2 + $0x20] sm:$0xff] }
   0x4   :  { %71 = vmatpush.msra.mxu0 %v49_v1 }
   0x6   :  { %72 = vmatpush.msra.mxu0 %v48_v2 }
   0x7   :  { %18 = vsyncpa [#allocation3], 0  ;;  %v46_v4 = vld [vmem:[%s588_s2 + $0x18] sm:$0xff]  ;;  %v45_v5 = vld [vmem:[%s588_s2 + $0x10] sm:$0xff]  ;;  %vm55_vm0 = vcmask 523264   ;;  %v371_v14 = vmov 0   ;;  %v131_v25 = vlaneseq }
   0x8   :  { %73 = vmatpush.msra.mxu0 %v47_v3  ;;  %v44_v6 = vld [vmem:[%s588_s2 + $0x8] sm:$0xff]  ;;  %v43_v7 = vld [vmem:[%s588_s2] sm:$0xff]  ;;  %v90_v10 = vld [vmem:[%s590_s4 + $0x18] sm:$0xff]  ;;  %330 = vset.pattern.permute.xlu0 %v371_v14  ;;  %vm91_vm1 = vcmask 261120   ;;  %vm135_vm2 = vcmask 1041409   ;;  %vm139_vm4 = vcmask 58368  }
   0x9   :  { %v465_v8 = vld [vmem:[%s586_s0] sm:$0xff]  ;;  %v472_v9 = vld [vmem:[%s586_s0 + $0x8] sm:$0xff]  ;;  %110 = vmatpush.msra.mxu3 %v90_v10  ;;  %v89_v11 = vld [vmem:[%s590_s4 + $0x10] sm:$0xff]  ;;  %v132_v26 = vand.u32 127, %v131_v25  ;;  %v166_v39 = vshrl.u32 %v131_v25, 7  ;;  %s307_s14 = sshll.u32 %s597_s11, 4  ;;  %s308_s14 = int_to_ptr.hbm [resolvable:$true] %s307_s14 }
   0xa   :  { %74 = vmatpush.msra.mxu0 %v46_v4  ;;  %v88_v12 = vld [vmem:[%s590_s4 + $0x8] sm:$0xff]  ;;  %v87_v13 = vld [vmem:[%s590_s4] sm:$0xff]  ;;  %v201_v54 = vld [vmem:[%s591_s5 + $0x38] sm:$0xff] }
   0xb   :  { %111 = vmatpush.msra.mxu3 %v89_v11  ;;  %v333_v15 = vld [vmem:[%s589_s3] ss:$0 sm:$0xff]  ;;  %331 = vset.pattern.permute.xlu2 %v166_v39  ;;  %v200_v55 = vld [vmem:[%s591_s5 + $0x30] sm:$0xff]  ;;  %v199_v56 = vld [vmem:[%s591_s5 + $0x28] sm:$0xff] }
   0xc   :  { %75 = vmatpush.msra.mxu0 %v45_v5  ;;  %v121_v27 = vld [vmem:[%s587_s1] sm:$0x3]  ;;  %219 = vmatpush.msra.mxu2 %v201_v54  ;;  %v197_v58 = vld [vmem:[%s591_s5 + $0x18] sm:$0xff]  ;;  %v196_v59 = vld [vmem:[%s591_s5 + $0x10] sm:$0xff]  ;;  %s372_s1 = smov [#allocation2]  }
   0xd   :  { %112 = vmatpush.msra.mxu3 %v88_v12  ;;  %vm122_vm3 = vcmp.gt.f32.partialorder %v121_v27, 0.0  ;;  %v198_v57 = vld [vmem:[%s591_s5 + $0x20] sm:$0xff]  ;;  %v195_v60 = vld [vmem:[%s591_s5 + $0x8] sm:$0xff]  ;;  %v234_v62 = vld [vmem:[%s593_s7 + $0x18] sm:$0xff] }
   0xe   :  { %76 = vmatpush.msra.mxu0 %v44_v6  ;;  %220 = vmatpush.msra.mxu2 %v200_v55  ;;  %v194_v61 = vld [vmem:[%s591_s5] sm:$0xff]  ;;  %v270_v63 = vld [vmem:[%s595_s9 + $0x38] sm:$0xff]  ;;  %v269_v0 = vld [vmem:[%s595_s9 + $0x30] sm:$0xff]  ;;  %s305_s5 = sshll.u32 %s372_s1, 4  ;;  %s306_s5 = int_to_ptr.vmem [resolvable:$true] %s305_s5 }
   0xf   :  { %113 = vmatpush.msra.mxu3 %v87_v13  ;;  %283 = vmatpush.msra.mxu1 %v270_v63  ;;  %v233_v1 = vld [vmem:[%s593_s7 + $0x10] sm:$0xff]  ;;  %v268_v2 = vld [vmem:[%s595_s9 + $0x28] sm:$0xff]  ;;  %v267_v4 = vld [vmem:[%s595_s9 + $0x20] sm:$0xff] }
  0x10   :  { %77 = vmatpush.msra.mxu0 %v43_v7  ;;  %221 = vmatpush.msra.mxu2 %v199_v56  ;;  %v232_v3 = vld [vmem:[%s593_s7 + $0x8] sm:$0xff]  ;;  %v231_v5 = vld [vmem:[%s593_s7] sm:$0xff]  ;;  %v266_v6 = vld [vmem:[%s595_s9 + $0x18] sm:$0xff] }
  0x11   :  { %320 = vmatmul.msk.f32.vlgmr.msra.gmra.mxu0 %vm55_vm0, %v465_v8  ;;  %254 = vmatpush.msrb.mxu3 %v234_v62  ;;  %v265_v11 = vld [vmem:[%s595_s9 + $0x10] sm:$0xff]  ;;  %v264_v13 = vld [vmem:[%s595_s9 + $0x8] sm:$0xff] }
  0x12   :  { %222 = vmatpush.msra.mxu2 %v198_v57  ;;  %284 = vmatpush.msra.mxu1 %v269_v0 }
  0x13   :  { %255 = vmatpush.msrb.mxu3 %v233_v1 }
  0x14   :  { %223 = vmatpush.msra.mxu2 %v197_v58  ;;  %285 = vmatpush.msra.mxu1 %v268_v2 }
  0x15   :  { %256 = vmatpush.msrb.mxu3 %v232_v3 }
  0x16   :  { %224 = vmatpush.msra.mxu2 %v196_v59  ;;  %286 = vmatpush.msra.mxu1 %v267_v4 }
  0x17   :  { %257 = vmatpush.msrb.mxu3 %v231_v5 }
  0x18   :  { %225 = vmatpush.msra.mxu2 %v195_v60  ;;  %287 = vmatpush.msra.mxu1 %v266_v6 }
  0x19   :  { %321 = vmatmul.msk.f32.gmra.mxu0 %vm55_vm0, %v472_v9 }
  0x1a   :  { %226 = vmatpush.msra.mxu2 %v194_v61  ;;  %288 = vmatpush.msra.mxu1 %v265_v11 }
  0x1c   :  { %289 = vmatpush.msra.mxu1 %v264_v13 }
  0x8e   :  { %v79_v16 = vpop.f32.mrf.mxu0 }
  0x8f   :  { %v80_v17 = vadd.f32 %v333_v15, %v79_v16 }
  0x91   :  { %337 = vtanh.f32 %v80_v17 }
  0x96   :  { %v82_v18 = vpop.f32.mrf.mxu0 }
  0x97   :  { %v338_v19 = vpop.eup %337  ;;  %v83_v20 = vadd.f32 %v333_v15, %v82_v18 }
  0x98   :  { %322 = vmatmul.msk.f32.vlgmr.msra.gmra.mxu3 %vm91_vm1, %v338_v19 }
  0x99   :  { %339 = vtanh.f32 %v83_v20 }
  0x9f   :  { %v340_v21 = vpop.eup %339 }
  0xa0   :  { %323 = vmatmul.msk.f32.gmra.mxu3 %vm91_vm1, %v340_v21 }
 0x11b   :  { %v115_v22 = vpop.f32.mrf.mxu3 }
 0x11c   :  { %126 = vperm.xlu0 %330, %v115_v22  }
 0x123   :  { %v118_v23 = vpop.f32.mrf.mxu3 }
 0x124   :  { %129 = vperm.xlu0 %330, %v118_v23  }
 0x12c   :  { %332 = vset.pattern.permute.xlu0 %v166_v39 }
 0x18e   :  { %v127_v24 = vpop.permute.xlu0 %126 }
 0x18f   :  { %v133_v29 = vperm.slane %v127_v24, %v132_v26 }
 0x196   :  { %v130_v28 = vpop.permute.xlu0 %129 }
 0x197   :  { %v134_v30 = vperm.slane %v130_v28, %v132_v26 }
 0x199   :  { %v136_v31 = vsel %vm135_vm2, %v134_v30, %v133_v29  ;;  %v263_v30 = vld [vmem:[%s595_s9] sm:$0xff] }
 0x19a   :  { %v138_v32 = vsel %vm122_vm3, %v136_v31, -1e+30  ;;  %290 = vmatpush.msra.mxu1 %v263_v30  ;;  %v334_v31 = vld [vmem:[%s592_s6] ss:$0 sm:$0xff] }
 0x19b   :  { %v140_v33 = vsel %vm139_vm4, %v138_v32, -inf  ;;  %326 = vmatmul.msk.f32.vlgmr.msra.gmra.mxu1 %vm55_vm0, %v465_v8 }
 0x19c   :  { %141 = vmax.xlane.f32.xlu1 %v140_v33 }
 0x1a3   :  { %327 = vmatmul.msk.f32.gmra.mxu1 %vm55_vm0, %v472_v9 }
 0x20f   :  { %v142_v34 = vpop.xlane.xlu1 %141 }
 0x210   :  { %v143_v35 = vsub.f32 %v138_v32, %v142_v34  ;;  %v335_v34 = vld [vmem:[%s596_s10] ss:$0 sm:$0xff] }
 0x212   :  { %v144_v36 = vmul.f32 1.442695, %v143_v35 }
 0x214   :  { %341 = vpow2.f32 %v144_v36 }
 0x218   :  { %v292_v35 = vpop.f32.mrf.mxu1 }
 0x219   :  { %v293_v36 = vadd.f32 %v335_v34, %v292_v35 }
 0x21a   :  { %v342_v37 = vpop.eup %341 }
 0x21b   :  { %v146_v38 = vsel %vm139_vm4, %v342_v37, 0.0  ;;  %298 = vst [vmem:[%s598_s12] sm:$0xff] %v293_v36 }
 0x21c   :  { %147 = vadd.xlane.f32.xlu1 %v146_v38 }
 0x28f   :  { %v148_v40 = vpop.xlane.xlu1 %147 }
 0x290   :  { %343 = vrcp.f32 %v148_v40  ;;  %v160_v44 = vand.u32 2147483648, %v148_v40  ;;  %v158_v46 = vand.u32 2147483647, %v148_v40  ;;  %vm154_vm6 = vweird.f32 %v148_v40 }
 0x292   :  { %v161_v48 = vor.u32 1.1754944e-38, %v160_v44  ;;  %vm159_vm8 = vcmp.eq.f32.partialorder %v158_v46, 8.507059e+37 }
 0x296   :  { %v344_v41 = vpop.eup %343 }
 0x297   :  { %v150_v42 = vmul.f32 %v344_v41, %v148_v40  ;;  %vm155_vm5 = vweird.f32 %v344_v41 }
 0x298   :  { %vm156_vm7 = vmor %vm154_vm6, %vm155_vm5 }
 0x299   :  { %v151_v43 = vsub.f32 1.0, %v150_v42 }
 0x29b   :  { %v152_v45 = vmul.f32 %v344_v41, %v151_v43 }
 0x29d   :  { %v153_v47 = vadd.f32 %v344_v41, %v152_v45 }
 0x29f   :  { %v157_v49 = vsel %vm156_vm7, %v344_v41, %v153_v47 }
 0x2a0   :  { %v162_v50 = vsel %vm159_vm8, %v161_v48, %v157_v49 }
 0x2a1   :  { %v163_v51 = vmul.f32 %v342_v37, %v162_v50  ;;  %v336_v37 = vld [vmem:[%s594_s8] ss:$0 sm:$0xff] }
 0x2a3   :  { %v164_v52 = vperm.slane %v163_v51, 0  ;;  %v171_v53 = vperm.slane %v163_v51, 1 }
 0x2a5   :  { %169 = vperm.xlu2 %331, %v164_v52  }
 0x2ad   :  { %176 = vperm.xlu2 %331, %v171_v53  }
 0x2ff   :  { %v170_v7 = vpop.permute.xlu2 %169 }
 0x300   :  { %v178_v10 = vmul.f32 %v170_v7, %v465_v8  ;;  %v295_v8 = vpop.f32.mrf.mxu1 }
 0x302   :  { %v180_v12 = vsel %vm55_vm0, %v178_v10, 0.0 }
 0x303   :  { %v181_v14 = vrot.slane %v180_v12, 4 }
 0x305   :  { %v182_v15 = vadd.f32 %v181_v14, %v180_v12 }
 0x307   :  { %v177_v16 = vpop.permute.xlu2 %176  ;;  %v183_v18 = vrot.slane %v182_v15, 2 }
 0x308   :  { %v179_v17 = vmul.f32 %v177_v16, %v472_v9  ;;  %v296_v9 = vadd.f32 %v335_v34, %v295_v8 }
 0x309   :  { %v184_v21 = vadd.f32 %v183_v18, %v182_v15 }
 0x30a   :  { %v187_v19 = vsel %vm55_vm0, %v179_v17, 0.0  ;;  %299 = vst [vmem:[%s598_s12 + $0x8] sm:$0xff] %v296_v9 }
 0x30b   :  { %v188_v20 = vrot.slane %v187_v19, 4  ;;  %v185_v24 = vrot.slane %v184_v21, 1 }
 0x30d   :  { %v189_v22 = vadd.f32 %v188_v20, %v187_v19  ;;  %v186_v27 = vadd.f32 %v185_v24, %v184_v21 }
 0x30f   :  { %v190_v23 = vrot.slane %v189_v22, 2 }
 0x311   :  { %v191_v25 = vadd.f32 %v190_v23, %v189_v22 }
 0x313   :  { %v192_v26 = vrot.slane %v191_v25, 1 }
 0x315   :  { %v193_v28 = vadd.f32 %v192_v26, %v191_v25 }
 0x317   :  { %v208_v29 = vsel %vm135_vm2, %v193_v28, %v186_v27 }
 0x318   :  { %324 = vmatmul.msk.f32.vlgmr.msra.gmra.mxu2 %vm55_vm0, %v208_v29 }
 0x39b   :  { %v228_v32 = vpop.f32.mrf.mxu2 }
 0x39c   :  { %v229_v33 = vadd.f32 %v334_v31, %v228_v32 }
 0x39e   :  { %325 = vmatmul.msk.f32.vlgmr.msrb.gmra.mxu3 %vm91_vm1, %v229_v33 }
 0x421   :  { %v259_v38 = vpop.f32.mrf.mxu3 }
 0x422   :  { %v260_v39 = vadd.f32 %v336_v37, %v259_v38 }
 0x424   :  { %262 = vst [vmem:[#allocation2] sm:$0x3] %v260_v39 }
 0x425   :  { %310 = dma.vmem_to_hbm [thread:$0]  %s306_s5, 32, %s308_s14, [#allocation3]  }
 0x426   :  { %369 = dma.done.wait [#allocation3], 32  }
 0x427   :  { %370 = vsyncadd [#allocation3], 4294967264 }
 0x428   :  { %319 = vsyncpa [#allocation3], 1 }

// kernel: forward.2
= control target key start
LH: loop header
LB: loop body
LE: loop exit
PB: predicated region body
PF: predicated region fallthrough
CT: control target
= control target key end

     0   :  { %vm36_vm0 = vcmask 261120   ;;  %v1260_v15 = vmov 0.0   ;;  %vm150_vm1 = vcmask 1041408   ;;  %v1262_v51 = vmov 0   ;;  %s1264_s7 = smov 96   ;;  %s1894_s2 = inlined_call_operand.vmem [shape: f32[32,256], index: 2, kind: input, shape index: {}]   ;;  %s1895_s3 = inlined_call_operand.vmem [shape: f32[32,256], index: 3, kind: input, shape index: {}]   ;;  %s1896_s0 = inlined_call_operand.vmem [shape: f32[16,32], index: 0, kind: input, shape index: {}]   ;;  %s1897_s4 = inlined_call_operand.vmem [shape: f32[1,256], index: 4, kind: input, shape index: {}]   ;;  %s1898_s1 = inlined_call_operand.vmem [shape: f32[16,1], index: 1, kind: input, shape index: {}]   ;;  %s1899_s5 = inlined_call_operand.vmem [shape: f32[2,8,64], index: 5, kind: output, shape index: {}]  }
   0x1   :  { %v29_v0 = vld [vmem:[%s1894_s2 + $0x38] sm:$0xff]  ;;  %v27_v1 = vld [vmem:[%s1894_s2 + $0x28] sm:$0xff]  ;;  %v1318_v5 = vld [vmem:[%s1895_s3 + $0x30] sm:$0xff]  ;;  %1193 = vset.pattern.permute.xlu1 %v1262_v51  ;;  %1194 = vset.pattern.permute.xlu2 %v1262_v51 }
   0x2   :  { %v1304_v2 = vld [vmem:[%s1895_s3 + $0x38] sm:$0xff]  ;;  %78 = vmatpush.msra.mxu1 %v29_v0  ;;  %v1310_v3 = vld [vmem:[%s1895_s3 + $0x28] sm:$0xff]  ;;  %v1329_v7 = vld [vmem:[%s1895_s3 + $0x20] sm:$0xff]  ;;  %114 = vmatpush.msra.mxu2 %v1318_v5 }
   0x3   :  { %134 = vmatpush.msra.mxu3 %v1304_v2  ;;  %v25_v4 = vld [vmem:[%s1894_s2 + $0x18] sm:$0xff]  ;;  %v28_v8 = vld [vmem:[%s1894_s2 + $0x30] sm:$0xff]  ;;  %v23_v9 = vld [vmem:[%s1894_s2 + $0x8] sm:$0xff]  ;;  %1195 = vset.pattern.permute.xlu0 %v1262_v51 }
   0x4   :  { %v1323_v6 = vld [vmem:[%s1895_s3 + $0x18] sm:$0xff]  ;;  %79 = vmatpush.msra.mxu1 %v27_v1  ;;  %v1341_v10 = vld [vmem:[%s1895_s3 + $0x8] sm:$0xff]  ;;  %55 = vmatpush.msra.mxu0 %v28_v8  ;;  %v26_v11 = vld [vmem:[%s1894_s2 + $0x20] sm:$0xff] }
   0x5   :  { %135 = vmatpush.msra.mxu3 %v1310_v3  ;;  %v20_v12 = vld [vmem:[%s1896_s0] sm:$0xff]  ;;  %115 = vmatpush.msra.mxu2 %v1329_v7  ;;  %v1354_v13 = vld [vmem:[%s1895_s3 + $0x10] sm:$0xff]  ;;  %v21_v18 = vld [vmem:[%s1896_s0 + $0x8] sm:$0xff] }
   0x6   :  { %80 = vmatpush.msra.mxu1 %v25_v4  ;;  %56 = vmatpush.msra.mxu0 %v26_v11  ;;  %v24_v14 = vld [vmem:[%s1894_s2 + $0x10] sm:$0xff]  ;;  %v1364_v16 = vld [vmem:[%s1895_s3] sm:$0xff]  ;;  %v1437_v55 = vld [vmem:[%s1898_s1 + $0x8] sm:$0xff] }
   0x7   :  { %136 = vmatpush.msra.mxu3 %v1323_v6  ;;  %v22_v17 = vld [vmem:[%s1894_s2] sm:$0xff]  ;;  %116 = vmatpush.msra.mxu2 %v1354_v13  ;;  %v190_v56 = vrot.slane %v1437_v55, 4 }
   0x8   :  { %81 = vmatpush.msra.mxu1 %v23_v9  ;;  %57 = vmatpush.msra.mxu0 %v24_v14  ;;  %v1412_v19 = vld [vmem:[%s1897_s4] sm:$0x3]  ;;  %s1261_s4 = smov 32  }
   0x9   :  { %137 = vmatpush.msra.mxu3 %v1341_v10  ;;  %1164 = vmatmul.msk.f32.vlgmr.msra.gmra.mxu1 %vm36_vm0, %v20_v12  ;;  %v33_v20 = vperm.slane %v1412_v19, 1  ;;  %v32_v23 = vperm.slane %v1412_v19, 0  ;;  %v1444_v57 = vld [vmem:[%s1898_s1] sm:$0xff]  ;;  %s1263_s1 = smov 64  }
   0xa   :  { %138 = vmatmul.f32.vlgmr.msra.gmra.mxu3 %v1260_v15  ;;  %405 = vmatpush.msrb.mxu1 %v1304_v2  ;;  %v192_v59 = vsel %vm150_vm1, %v1444_v57, %v190_v56 }
   0xb   :  { %266 = vmatpush.msrb.mxu3 %v1304_v2  ;;  %117 = vmatpush.msra.mxu2 %v1364_v16  ;;  %vm193_vm6 = vcmp.gt.f32.partialorder %v192_v59, 0.0 }
   0xc   :  { %58 = vmatpush.msra.mxu0 %v22_v17  ;;  %118 = vmatmul.f32.vlgmr.msra.gmra.mxu2 %v1260_v15  ;;  %v194_v60 = vsel %vm193_vm6, 1, %v1262_v51 }
   0xd   :  { %1162 = vmatmul.msk.f32.vlgmr.msra.gmra.mxu0 %vm36_vm0, %v20_v12  ;;  %246 = vmatpush.msrb.mxu2 %v1318_v5 }
   0xe   :  { %267 = vmatpush.msrb.mxu3 %v1310_v3  ;;  %385 = vmatpush.msrb.mxu0 %v1318_v5 }
   0xf   :  { %406 = vmatpush.msrb.mxu1 %v1310_v3  ;;  %247 = vmatpush.msrb.mxu2 %v1329_v7 }
  0x10   :  { %268 = vmatpush.msrb.mxu3 %v1323_v6  ;;  %386 = vmatpush.msrb.mxu0 %v1329_v7 }
  0x11   :  { %1165 = vmatmul.msk.f32.gmra.mxu1 %vm36_vm0, %v21_v18  ;;  %248 = vmatpush.msrb.mxu2 %v1354_v13 }
  0x12   :  { %269 = vmatpush.msrb.mxu3 %v1341_v10  ;;  %387 = vmatpush.msrb.mxu0 %v1354_v13 }
  0x13   :  { %407 = vmatpush.msrb.mxu1 %v1323_v6  ;;  %249 = vmatpush.msrb.mxu2 %v1364_v16 }
  0x14   :  { %535 = vmatpush.msra.mxu3 %v1304_v2  ;;  %388 = vmatpush.msrb.mxu0 %v1364_v16 }
  0x15   :  { %1163 = vmatmul.msk.f32.gmra.mxu0 %vm36_vm0, %v21_v18  ;;  %408 = vmatpush.msrb.mxu1 %v1341_v10 }
  0x16   :  { %515 = vmatpush.msra.mxu2 %v1318_v5  ;;  %536 = vmatpush.msra.mxu3 %v1310_v3 }
  0x17   :  { %673 = vmatpush.msra.mxu1 %v1304_v2  ;;  %653 = vmatpush.msra.mxu0 %v1318_v5 }
  0x18   :  { %516 = vmatpush.msra.mxu2 %v1329_v7  ;;  %537 = vmatpush.msra.mxu3 %v1323_v6 }
  0x19   :  { %674 = vmatpush.msra.mxu1 %v1310_v3  ;;  %654 = vmatpush.msra.mxu0 %v1329_v7 }
  0x1a   :  { %517 = vmatpush.msra.mxu2 %v1354_v13  ;;  %538 = vmatpush.msra.mxu3 %v1341_v10 }
  0x1b   :  { %675 = vmatpush.msra.mxu1 %v1323_v6  ;;  %655 = vmatpush.msra.mxu0 %v1354_v13 }
  0x1c   :  { %518 = vmatpush.msra.mxu2 %v1364_v16 }
  0x1d   :  { %676 = vmatpush.msra.mxu1 %v1341_v10  ;;  %656 = vmatpush.msra.mxu0 %v1364_v16 }
  0x86   :  { %v83_v21 = vpop.f32.mrf.mxu1 }
  0x87   :  { %v1415_v22 = vadd.f32 %v83_v21, %v33_v20 }
  0x8a   :  { %v60_v24 = vpop.f32.mrf.mxu0 }
  0x8b   :  { %v1420_v27 = vadd.f32 %v60_v24, %v32_v23 }
  0x8d   :  { %v139_v25 = vpop.f32.mrf.mxu3 }
  0x8e   :  { %v144_v26 = vrot.slane %v139_v25, 4  ;;  %v86_v28 = vpop.f32.mrf.mxu1 }
  0x8f   :  { %v1422_v29 = vadd.f32 %v86_v28, %v33_v20  ;;  %v119_v30 = vpop.f32.mrf.mxu2  ;;  %v329_v28 = vrot.slane %v1437_v55, 2 }
  0x90   :  { %v142_v32 = vadd.f32 %v119_v30, %v1420_v27 }
  0x91   :  { %v146_v31 = vadd.f32 %v144_v26, %v1422_v29  ;;  %v327_v26 = vrot.slane %v1444_v57, 2 }
  0x93   :  { %v148_v33 = vrot.slane %v146_v31, 4  ;;  %v331_v30 = vsel %vm150_vm1, %v327_v26, %v329_v28 }
  0x94   :  { %vm332_vm8 = vcmp.gt.f32.partialorder %v331_v30, 0.0 }
  0x95   :  { %v151_v34 = vsel %vm150_vm1, %v142_v32, %v148_v33  ;;  %v333_v31 = vsel %vm332_vm8, 1, %v1262_v51 }
  0x96   :  { %1196 = vtanh.f32 %v151_v34  ;;  %v1166_v36 = vmul.f32 -1.442695, %v151_v34 }
  0x98   :  { %1198 = vpow2.f32 %v1166_v36 }
  0x9c   :  { %v1197_v35 = vpop.eup %1196 }
  0x9d   :  { %174 = vrot.lane.b32.xlu0 %v1197_v35, %s1261_s4 }
  0x9e   :  { %v1199_v37 = vpop.eup %1198 }
  0x9f   :  { %v155_v38 = vadd.f32 1.0, %v1199_v37 }
  0xa1   :  { %1200 = vrcp.f32 %v155_v38  ;;  %v167_v44 = vand.u32 2147483648, %v155_v38  ;;  %vm161_vm3 = vweird.f32 %v155_v38  ;;  %v165_v45 = vand.u32 2147483647, %v155_v38 }
  0xa3   :  { %v168_v47 = vor.u32 1.1754944e-38, %v167_v44  ;;  %vm166_vm5 = vcmp.eq.f32.partialorder %v165_v45, 8.507059e+37 }
  0xa7   :  { %v1201_v39 = vpop.eup %1200 }
  0xa8   :  { %v157_v40 = vmul.f32 %v1201_v39, %v155_v38  ;;  %vm162_vm2 = vweird.f32 %v1201_v39 }
  0xa9   :  { %vm163_vm4 = vmor %vm161_vm3, %vm162_vm2 }
  0xaa   :  { %v158_v41 = vsub.f32 1.0, %v157_v40 }
  0xac   :  { %v159_v42 = vmul.f32 %v1201_v39, %v158_v41 }
  0xae   :  { %v160_v43 = vadd.f32 %v1201_v39, %v159_v42 }
  0xb0   :  { %v164_v46 = vsel %vm163_vm4, %v1201_v39, %v160_v43 }
  0xb1   :  { %v169_v49 = vsel %vm166_vm5, %v168_v47, %v164_v46 }
  0xb2   :  { %v172_v52 = vmul.f32 0.0, %v169_v49 }
 0x10f   :  { %v175_v48 = vpop.permute.xlu0 %174 }
 0x110   :  { %v177_v50 = vmul.f32 %v175_v48, %v169_v49 }
 0x112   :  { %179 = vrot.lane.b32.xlu0 %v177_v50, %s1261_s4 }
 0x184   :  { %v180_v53 = vpop.permute.xlu0 %179 }
 0x185   :  { %v1432_v54 = vadd.f32 %v180_v53, %v172_v52 }
 0x187   :  { %1202 = vtanh.f32 %v1432_v54 }
 0x18d   :  { %v1203_v58 = vpop.eup %1202 }
 0x18e   :  { %185 = vrot.lane.b32.xlu1 %v1203_v58, %s1261_s4 }
 0x196   :  { %196 = vperm.xlu1 %1193, %v194_v60  }
 0x200   :  { %v186_v61 = vpop.permute.xlu1 %185 }
 0x201   :  { %v188_v62 = vmul.f32 %v186_v61, %v169_v49  ;;  %v1514_v61 = vpop.f32.mrf.mxu0 }
 0x208   :  { %v197_v63 = vpop.permute.xlu1 %196 }
 0x209   :  { %vm198_vm7 = vcmp.eq.s32.totalorder %v197_v63, 1 }
 0x20a   :  { %v1453_v0 = vsel %vm198_vm7, %v188_v62, 0.0  ;;  %v1483_v44 = vsel %vm198_vm7, %v1432_v54, 0.0 }
 0x20b   :  { %214 = vst [vmem:[#allocation1] sm:$0xff] %v1453_v0  ;;  %230 = vrot.lane.b32.xlu2 %v1453_v0, %s1263_s1 }
 0x212   :  { %v1490_v53 = vld [vmem:[#allocation1 + $0x2] ss:$9 sm:$0xff] }
 0x213   :  { %v1492_v58 = vld [vmem:[#allocation1 + $0x3] ss:$9 sm:$0xff] }
 0x265   :  { %v231_v1 = vpop.permute.xlu2 %230 }
 0x266   :  { %1167 = vmatmul.msk.f32.vlgmr.msrb.gmra.mxu2 %vm36_vm0, %v231_v1  ;;  %1168 = vmatmul.msk.f32.vlgmr.msrb.gmra.mxu3 %vm36_vm0, %v231_v1 }
 0x267   :  { %781 = vmatpush.msrb.mxu2 %v1318_v5  ;;  %801 = vmatpush.msrb.mxu3 %v1304_v2 }
 0x269   :  { %782 = vmatpush.msrb.mxu2 %v1329_v7  ;;  %802 = vmatpush.msrb.mxu3 %v1310_v3 }
 0x26b   :  { %783 = vmatpush.msrb.mxu2 %v1354_v13  ;;  %803 = vmatpush.msrb.mxu3 %v1323_v6 }
 0x26d   :  { %784 = vmatpush.msrb.mxu2 %v1364_v16  ;;  %804 = vmatpush.msrb.mxu3 %v1341_v10 }
 0x2e9   :  { %v251_v4 = vpop.f32.mrf.mxu2  ;;  %v271_v8 = vpop.f32.mrf.mxu3 }
 0x2ea   :  { %v275_v9 = vrot.slane %v251_v4, 6  ;;  %v279_v11 = vrot.slane %v271_v8, 6 }
 0x2ec   :  { %v277_v12 = vadd.f32 %v275_v9, %v1420_v27  ;;  %v281_v14 = vadd.f32 %v279_v11, %v1422_v29 }
 0x2ee   :  { %v283_v15 = vrot.slane %v277_v12, 2  ;;  %v286_v17 = vrot.slane %v281_v14, 2  ;;  %v459_v12 = vrot.slane %v1444_v57, 4 }
 0x2f0   :  { %v288_v18 = vsel %vm150_vm1, %v283_v15, %v286_v17  ;;  %v461_v15 = vsel %vm150_vm1, %v459_v12, %v1437_v55 }
 0x2f1   :  { %1204 = vtanh.f32 %v288_v18  ;;  %v1169_v21 = vmul.f32 -1.442695, %v288_v18  ;;  %vm462_vm14 = vcmp.gt.f32.partialorder %v461_v15, 0.0 }
 0x2f2   :  { %v463_v17 = vsel %vm462_vm14, 1, %v1262_v51 }
 0x2f3   :  { %1206 = vpow2.f32 %v1169_v21 }
 0x2f7   :  { %v1205_v20 = vpop.eup %1204 }
 0x2f8   :  { %311 = vrot.lane.b32.xlu2 %v1205_v20, %s1261_s4 }
 0x2f9   :  { %v1207_v24 = vpop.eup %1206 }
 0x2fa   :  { %v292_v25 = vadd.f32 1.0, %v1207_v24 }
 0x2fc   :  { %1208 = vrcp.f32 %v292_v25  ;;  %v304_v37 = vand.u32 2147483648, %v292_v25  ;;  %vm298_vm10 = vweird.f32 %v292_v25  ;;  %v302_v38 = vand.u32 2147483647, %v292_v25 }
 0x2fe   :  { %v305_v40 = vor.u32 1.1754944e-38, %v304_v37  ;;  %vm303_vm12 = vcmp.eq.f32.partialorder %v302_v38, 8.507059e+37 }
 0x300   :  { %335 = vperm.xlu2 %1194, %v333_v31  }
 0x302   :  { %v1209_v32 = vpop.eup %1208 }
 0x303   :  { %v294_v33 = vmul.f32 %v1209_v32, %v292_v25  ;;  %vm299_vm9 = vweird.f32 %v1209_v32 }
 0x304   :  { %vm300_vm11 = vmor %vm298_vm10, %vm299_vm9 }
 0x305   :  { %v295_v34 = vsub.f32 1.0, %v294_v33 }
 0x307   :  { %v296_v35 = vmul.f32 %v1209_v32, %v295_v34 }
 0x309   :  { %v297_v36 = vadd.f32 %v1209_v32, %v296_v35 }
 0x30b   :  { %v301_v39 = vsel %vm300_vm11, %v1209_v32, %v297_v36 }
 0x30c   :  { %v306_v42 = vsel %vm303_vm12, %v305_v40, %v301_v39 }
 0x30d   :  { %v309_v45 = vmul.f32 %v306_v42, %v1483_v44 }
 0x352   :  { %v312_v41 = vpop.permute.xlu2 %311 }
 0x353   :  { %v314_v43 = vmul.f32 %v312_v41, %v306_v42 }
 0x355   :  { %316 = vrot.lane.b32.xlu0 %v314_v43, %s1261_s4 }
 0x35a   :  { %v336_v49 = vpop.permute.xlu2 %335 }
 0x35b   :  { %vm337_vm13 = vcmp.eq.s32.totalorder %v336_v49, 1 }
 0x3c7   :  { %v317_v46 = vpop.permute.xlu0 %316 }
 0x3c8   :  { %v1486_v47 = vadd.f32 %v317_v46, %v309_v45 }
 0x3ca   :  { %1210 = vtanh.f32 %v1486_v47  ;;  %v1530_v40 = vsel %vm337_vm13, %v1486_v47, %v1483_v44 }
 0x3d0   :  { %v1211_v48 = vpop.eup %1210 }
 0x3d1   :  { %322 = vrot.lane.b32.xlu1 %v1211_v48, %s1261_s4 }
 0x443   :  { %v323_v50 = vpop.permute.xlu1 %322 }
 0x444   :  { %v325_v52 = vmul.f32 %v323_v50, %v306_v42 }
 0x446   :  { %v1495_v54 = vsel %vm337_vm13, %v325_v52, 0.0  ;;  %v1499_v59 = vsel %vm337_vm13, %v325_v52, %v1453_v0 }
 0x447   :  { %353 = vst [vmem:[#allocation1] sm:$0xff] %v1495_v54  ;;  %369 = vrot.lane.b32.xlu0 %v1499_v59, %s1263_s1 }
 0x44e   :  { %v1540_v52 = vld [vmem:[#allocation1 + $0x2] ss:$9 sm:$0xff] }
 0x44f   :  { %v1542_v44 = vld [vmem:[#allocation1 + $0x3] ss:$9 sm:$0xff] }
 0x4b9   :  { %v370_v60 = vpop.permute.xlu0 %369 }
 0x4ba   :  { %1170 = vmatmul.msk.f32.vlgmr.msrb.gmra.mxu0 %vm36_vm0, %v370_v60  ;;  %1171 = vmatmul.msk.f32.vlgmr.msrb.gmra.mxu1 %vm36_vm0, %v370_v60 }
 0x4bb   :  { %915 = vmatpush.msrb.mxu0 %v1318_v5  ;;  %935 = vmatpush.msrb.mxu1 %v1304_v2 }
 0x4bd   :  { %916 = vmatpush.msrb.mxu0 %v1329_v7  ;;  %936 = vmatpush.msrb.mxu1 %v1310_v3 }
 0x4bf   :  { %917 = vmatpush.msrb.mxu0 %v1354_v13  ;;  %937 = vmatpush.msrb.mxu1 %v1323_v6 }
 0x4c1   :  { %918 = vmatpush.msrb.mxu0 %v1364_v16  ;;  %938 = vmatpush.msrb.mxu1 %v1341_v10 }
 0x537   :  { %v390_v62 = vpop.f32.mrf.mxu0  ;;  %v410_v1 = vpop.f32.mrf.mxu1 }
 0x538   :  { %v414_v63 = vrot.slane %v390_v62, 4  ;;  %v417_v9 = vadd.f32 %v410_v1, %v1422_v29 }
 0x53a   :  { %v416_v4 = vadd.f32 %v414_v63, %v1420_v27 }
 0x53c   :  { %v419_v8 = vrot.slane %v416_v4, 4 }
 0x53e   :  { %v421_v11 = vsel %vm150_vm1, %v419_v8, %v417_v9  ;;  %v597_v8 = vrot.slane %v1437_v55, 6 }
 0x53f   :  { %1212 = vtanh.f32 %v421_v11  ;;  %v1172_v18 = vmul.f32 -1.442695, %v421_v11  ;;  %v727_v11 = vsel %vm150_vm1, %v1437_v55, %v459_v12 }
 0x540   :  { %vm728_vm7 = vcmp.gt.f32.partialorder %v727_v11, 0.0 }
 0x541   :  { %1214 = vpow2.f32 %v1172_v18 }
 0x545   :  { %v1213_v14 = vpop.eup %1212 }
 0x546   :  { %444 = vrot.lane.b32.xlu1 %v1213_v14, %s1261_s4  ;;  %v729_v14 = vsel %vm728_vm7, 1, %v1262_v51 }
 0x547   :  { %v1215_v20 = vpop.eup %1214 }
 0x548   :  { %v425_v21 = vadd.f32 1.0, %v1215_v20 }
 0x54a   :  { %1216 = vrcp.f32 %v425_v21  ;;  %v437_v33 = vand.u32 2147483648, %v425_v21  ;;  %vm431_vm2 = vweird.f32 %v425_v21  ;;  %v435_v34 = vand.u32 2147483647, %v425_v21 }
 0x54c   :  { %v438_v36 = vor.u32 1.1754944e-38, %v437_v33  ;;  %vm436_vm4 = vcmp.eq.f32.partialorder %v435_v34, 8.507059e+37 }
 0x54e   :  { %465 = vperm.xlu1 %1193, %v463_v17  }
 0x550   :  { %v1217_v24 = vpop.eup %1216 }
 0x551   :  { %v427_v25 = vmul.f32 %v1217_v24, %v425_v21  ;;  %vm432_vm15 = vweird.f32 %v1217_v24 }
 0x552   :  { %vm433_vm3 = vmor %vm431_vm2, %vm432_vm15 }
 0x553   :  { %v428_v30 = vsub.f32 1.0, %v427_v25 }
 0x555   :  { %v429_v31 = vmul.f32 %v1217_v24, %v428_v30 }
 0x557   :  { %v430_v32 = vadd.f32 %v1217_v24, %v429_v31 }
 0x559   :  { %v434_v35 = vsel %vm433_vm3, %v1217_v24, %v430_v32 }
 0x55a   :  { %v439_v38 = vsel %vm436_vm4, %v438_v36, %v434_v35 }
 0x55b   :  { %v442_v41 = vmul.f32 %v439_v38, %v1530_v40 }
 0x5b8   :  { %v445_v37 = vpop.permute.xlu1 %444 }
 0x5b9   :  { %v447_v39 = vmul.f32 %v445_v37, %v439_v38 }
 0x5bb   :  { %449 = vrot.lane.b32.xlu2 %v447_v39, %s1261_s4 }
 0x5c0   :  { %v1537_v46 = vpop.permute.xlu1 %465 }
 0x5c1   :  { %vm467_vm5 = vcmp.eq.s32.totalorder %v1537_v46, 1 }
 0x615   :  { %v450_v42 = vpop.permute.xlu2 %449 }
 0x616   :  { %v1533_v43 = vadd.f32 %v450_v42, %v442_v41 }
 0x618   :  { %1218 = vtanh.f32 %v1533_v43  ;;  %v469_v34 = vsel %vm467_vm5, %v1533_v43, %v1530_v40 }
 0x61e   :  { %v1219_v45 = vpop.eup %1218 }
 0x61f   :  { %455 = vrot.lane.b32.xlu0 %v1219_v45, %s1261_s4 }
 0x691   :  { %v456_v48 = vpop.permute.xlu0 %455 }
 0x692   :  { %v458_v50 = vmul.f32 %v456_v48, %v439_v38 }
 0x694   :  { %v1546_v47 = vsel %vm467_vm5, %v458_v50, 0.0  ;;  %v1551_v49 = vsel %vm467_vm5, %v458_v50, %v1499_v59 }
 0x695   :  { %483 = vst [vmem:[#allocation1] sm:$0xff] %v1546_v47  ;;  %499 = vrot.lane.b32.xlu2 %v1551_v49, %s1263_s1 }
 0x69c   :  { %v1589_v45 = vld [vmem:[#allocation1 + $0x3] ss:$9 sm:$0xff] }
 0x69d   :  { %v1596_v40 = vld [vmem:[#allocation1 + $0x2] ss:$9 sm:$0xff] }
 0x6ef   :  { %v500_v60 = vpop.permute.xlu2 %499 }
 0x6f0   :  { %1173 = vmatmul.msk.f32.vlgmr.msra.gmra.mxu2 %vm36_vm0, %v500_v60  ;;  %1174 = vmatmul.msk.f32.vlgmr.msra.gmra.mxu3 %vm36_vm0, %v500_v60 }
 0x6f1   :  { %1043 = vmatpush.msra.mxu2 %v1318_v5  ;;  %1063 = vmatpush.msra.mxu3 %v1304_v2 }
 0x6f3   :  { %1044 = vmatpush.msra.mxu2 %v1329_v7  ;;  %1064 = vmatpush.msra.mxu3 %v1310_v3 }
 0x6f5   :  { %1045 = vmatpush.msra.mxu2 %v1354_v13  ;;  %1065 = vmatpush.msra.mxu3 %v1323_v6 }
 0x6f7   :  { %1046 = vmatpush.msra.mxu2 %v1364_v16  ;;  %1066 = vmatpush.msra.mxu3 %v1341_v10  ;;  %v595_v10 = vrot.slane %v1444_v57, 6 }
 0x773   :  { %v520_v59 = vpop.f32.mrf.mxu2  ;;  %v540_v62 = vpop.f32.mrf.mxu3 }
 0x774   :  { %v544_v63 = vrot.slane %v520_v59, 2  ;;  %v548_v1 = vrot.slane %v540_v62, 2  ;;  %v1605_v62 = vadd.f32 %v1514_v61, %v32_v23 }
 0x776   :  { %v546_v5 = vadd.f32 %v544_v63, %v1420_v27  ;;  %v550_v2 = vadd.f32 %v548_v1, %v1422_v29  ;;  %v599_v27 = vsel %vm150_vm1, %v595_v10, %v597_v8 }
 0x777   :  { %vm600_vm6 = vcmp.gt.f32.partialorder %v599_v27, 0.0 }
 0x778   :  { %v552_v4 = vrot.slane %v546_v5, 6  ;;  %v555_v7 = vrot.slane %v550_v2, 6  ;;  %v601_v29 = vsel %vm600_vm6, 1, %v1262_v51 }
 0x77a   :  { %v557_v3 = vsel %vm150_vm1, %v552_v4, %v555_v7 }
 0x77b   :  { %1220 = vtanh.f32 %v557_v3  ;;  %v1175_v6 = vmul.f32 -1.442695, %v557_v3 }
 0x77d   :  { %1222 = vpow2.f32 %v1175_v6 }
 0x781   :  { %v1221_v13 = vpop.eup %1220 }
 0x782   :  { %580 = vrot.lane.b32.xlu0 %v1221_v13, %s1261_s4 }
 0x783   :  { %v1223_v16 = vpop.eup %1222 }
 0x784   :  { %v561_v9 = vadd.f32 1.0, %v1223_v16 }
 0x786   :  { %1224 = vrcp.f32 %v561_v9  ;;  %v573_v24 = vand.u32 2147483648, %v561_v9  ;;  %vm567_vm9 = vweird.f32 %v561_v9  ;;  %v571_v25 = vand.u32 2147483647, %v561_v9 }
 0x788   :  { %v574_v31 = vor.u32 1.1754944e-38, %v573_v24  ;;  %vm572_vm11 = vcmp.eq.f32.partialorder %v571_v25, 8.507059e+37 }
 0x78a   :  { %603 = vperm.xlu0 %1195, %v601_v29  }
 0x78c   :  { %v1225_v15 = vpop.eup %1224 }
 0x78d   :  { %v563_v17 = vmul.f32 %v1225_v15, %v561_v9  ;;  %vm568_vm8 = vweird.f32 %v1225_v15 }
 0x78e   :  { %vm569_vm10 = vmor %vm567_vm9, %vm568_vm8 }
 0x78f   :  { %v564_v18 = vsub.f32 1.0, %v563_v17 }
 0x791   :  { %v565_v20 = vmul.f32 %v1225_v15, %v564_v18 }
 0x792   :  { %731 = vperm.xlu0 %1195, %v729_v14  }
 0x793   :  { %v566_v21 = vadd.f32 %v1225_v15, %v565_v20 }
 0x795   :  { %v570_v30 = vsel %vm569_vm10, %v1225_v15, %v566_v21 }
 0x796   :  { %v575_v32 = vsel %vm572_vm11, %v574_v31, %v570_v30 }
 0x797   :  { %v578_v35 = vmul.f32 %v575_v32, %v469_v34 }
 0x7f4   :  { %v581_v12 = vpop.permute.xlu0 %580 }
 0x7f5   :  { %v583_v33 = vmul.f32 %v581_v12, %v575_v32 }
 0x7f7   :  { %585 = vrot.lane.b32.xlu1 %v583_v33, %s1261_s4 }
 0x7fc   :  { %v604_v39 = vpop.permute.xlu0 %603 }
 0x7fd   :  { %vm605_vm12 = vcmp.eq.s32.totalorder %v604_v39, 1 }
 0x804   :  { %v732_v25 = vpop.permute.xlu0 %731 }
 0x805   :  { %vm733_vm3 = vcmp.eq.s32.totalorder %v732_v25, 1 }
 0x869   :  { %v586_v36 = vpop.permute.xlu1 %585 }
 0x86a   :  { %v588_v37 = vadd.f32 %v586_v36, %v578_v35 }
 0x86c   :  { %1226 = vtanh.f32 %v588_v37  ;;  %v607_v17 = vsel %vm605_vm12, %v588_v37, %v469_v34 }
 0x872   :  { %v1227_v38 = vpop.eup %1226 }
 0x873   :  { %591 = vrot.lane.b32.xlu2 %v1227_v38, %s1261_s4 }
 0x8cd   :  { %v592_v41 = vpop.permute.xlu2 %591 }
 0x8ce   :  { %v594_v42 = vmul.f32 %v592_v41, %v575_v32 }
 0x8d0   :  { %v1592_v48 = vsel %vm605_vm12, %v594_v42, 0.0  ;;  %v606_v46 = vsel %vm605_vm12, %v594_v42, %v1551_v49 }
 0x8d1   :  { %637 = vrot.lane.b32.xlu1 %v606_v46, %s1263_s1  ;;  %621 = vst [vmem:[#allocation1] sm:$0xff] %v1592_v48 }
 0x8d8   :  { %v1618_v33 = vld [vmem:[#allocation1 + $0x2] ss:$9 sm:$0xff] }
 0x8d9   :  { %v1620_v35 = vld [vmem:[#allocation1 + $0x3] ss:$9 sm:$0xff] }
 0x943   :  { %v638_v43 = vpop.permute.xlu1 %637 }
 0x944   :  { %1176 = vmatmul.msk.f32.vlgmr.msra.gmra.mxu0 %vm36_vm0, %v638_v43  ;;  %1177 = vmatmul.msk.f32.vlgmr.msra.gmra.mxu1 %vm36_vm0, %v638_v43 }
 0x9c1   :  { %v678_v50 = vpop.f32.mrf.mxu1  ;;  %v658_v59 = vpop.f32.mrf.mxu0 }
 0x9c2   :  { %v683_v60 = vrot.slane %v678_v50, 4  ;;  %v681_v63 = vadd.f32 %v658_v59, %v1605_v62  ;;  %v861_v59 = vsel %vm150_vm1, %v329_v28, %v327_v26 }
 0x9c3   :  { %vm862_vm4 = vcmp.gt.f32.partialorder %v861_v59, 0.0 }
 0x9c4   :  { %v685_v49 = vadd.f32 %v683_v60, %v1415_v22 }
 0x9c6   :  { %v687_v1 = vrot.slane %v685_v49, 4  ;;  %v863_v49 = vsel %vm862_vm4, 1, %v1262_v51  ;;  %vm227_vm4 = vcmask 516352  }
 0x9c8   :  { %v689_v5 = vsel %vm150_vm1, %v681_v63, %v687_v1 }
 0x9c9   :  { %1228 = vtanh.f32 %v689_v5  ;;  %v1178_v4 = vmul.f32 -1.442695, %v689_v5 }
 0x9cb   :  { %1230 = vpow2.f32 %v1178_v4 }
 0x9cf   :  { %v1229_v2 = vpop.eup %1228 }
 0x9d0   :  { %712 = vrot.lane.b32.xlu2 %v1229_v2, %s1261_s4 }
 0x9d1   :  { %v1231_v7 = vpop.eup %1230 }
 0x9d2   :  { %v693_v3 = vadd.f32 1.0, %v1231_v7 }
 0x9d4   :  { %1232 = vrcp.f32 %v693_v3  ;;  %v705_v16 = vand.u32 2147483648, %v693_v3  ;;  %vm699_vm14 = vweird.f32 %v693_v3  ;;  %v703_v9 = vand.u32 2147483647, %v693_v3 }
 0x9d6   :  { %v706_v29 = vor.u32 1.1754944e-38, %v705_v16  ;;  %vm704_vm2 = vcmp.eq.f32.partialorder %v703_v9, 8.507059e+37 }
 0x9da   :  { %v1233_v19 = vpop.eup %1232 }
 0x9db   :  { %v695_v13 = vmul.f32 %v1233_v19, %v693_v3  ;;  %vm700_vm13 = vweird.f32 %v1233_v19 }
 0x9dc   :  { %vm701_vm15 = vmor %vm699_vm14, %vm700_vm13 }
 0x9dd   :  { %v696_v23 = vsub.f32 1.0, %v695_v13 }
 0x9df   :  { %v697_v61 = vmul.f32 %v1233_v19, %v696_v23 }
 0x9e1   :  { %v698_v6 = vadd.f32 %v1233_v19, %v697_v61 }
 0x9e3   :  { %v702_v27 = vsel %vm701_vm15, %v1233_v19, %v698_v6 }
 0x9e4   :  { %v707_v14 = vsel %vm704_vm2, %v706_v29, %v702_v27 }
 0x9e5   :  { %v710_v18 = vmul.f32 %v707_v14, %v607_v17 }
 0xa2a   :  { %v713_v11 = vpop.permute.xlu2 %712 }
 0xa2b   :  { %v715_v15 = vmul.f32 %v713_v11, %v707_v14 }
 0xa2d   :  { %717 = vrot.lane.b32.xlu1 %v715_v15, %s1261_s4 }
 0xa9f   :  { %v718_v20 = vpop.permute.xlu1 %717 }
 0xaa0   :  { %v720_v21 = vadd.f32 %v718_v20, %v710_v18 }
 0xaa2   :  { %1234 = vtanh.f32 %v720_v21  ;;  %v735_v9 = vsel %vm733_vm3, %v720_v21, %v607_v17 }
 0xaa8   :  { %v1235_v24 = vpop.eup %1234 }
 0xaa9   :  { %723 = vrot.lane.b32.xlu2 %v1235_v24, %s1261_s4 }
 0xb03   :  { %v724_v30 = vpop.permute.xlu2 %723 }
 0xb04   :  { %v726_v31 = vmul.f32 %v724_v30, %v707_v14 }
 0xb06   :  { %v1615_v12 = vsel %vm733_vm3, %v726_v31, 0.0  ;;  %v734_v32 = vsel %vm733_vm3, %v726_v31, %v606_v46  ;;  %vm211_vm3 = vcmask 253952  }
 0xb07   :  { %765 = vrot.lane.b32.xlu1 %v734_v32, %s1263_s1  ;;  %749 = vst [vmem:[#allocation1] sm:$0xff] %v1615_v12 }
 0xb0e   :  { %v1643_v31 = vld [vmem:[#allocation1 + $0x2] ss:$9 sm:$0xff] }
 0xb0f   :  { %v1645_v25 = vld [vmem:[#allocation1 + $0x3] ss:$9 sm:$0xff] }
 0xb79   :  { %v766_v34 = vpop.permute.xlu1 %765 }
 0xb7a   :  { %1179 = vmatmul.msk.f32.vlgmr.msrb.gmra.mxu2 %vm36_vm0, %v766_v34  ;;  %1180 = vmatmul.msk.f32.vlgmr.msrb.gmra.mxu3 %vm36_vm0, %v766_v34 }
 0xbfd   :  { %v786_v36 = vpop.f32.mrf.mxu2  ;;  %v806_v37 = vpop.f32.mrf.mxu3 }
 0xbfe   :  { %v810_v38 = vrot.slane %v786_v36, 6  ;;  %v814_v39 = vrot.slane %v806_v37, 6 }
 0xc00   :  { %v812_v41 = vadd.f32 %v810_v38, %v1605_v62  ;;  %v816_v42 = vadd.f32 %v814_v39, %v1415_v22 }
 0xc02   :  { %v818_v46 = vrot.slane %v812_v41, 2  ;;  %v821_v43 = vrot.slane %v816_v42, 2  ;;  %v989_v42 = vsel %vm150_vm1, %v190_v56, %v1444_v57  ;;  %v610_v57 = vrot.slane %v1592_v48, 1 }
 0xc03   :  { %vm990_vm10 = vcmp.gt.f32.partialorder %v989_v42, 0.0 }
 0xc04   :  { %v823_v50 = vsel %vm150_vm1, %v818_v46, %v821_v43  ;;  %v991_v46 = vsel %vm990_vm10, 1, %v1262_v51  ;;  %v612_v55 = vperm.slane %v610_v57, 0 }
 0xc05   :  { %1236 = vtanh.f32 %v823_v50  ;;  %v1181_v63 = vmul.f32 -1.442695, %v823_v50 }
 0xc07   :  { %1238 = vpow2.f32 %v1181_v63 }
 0xc0b   :  { %v1237_v60 = vpop.eup %1236 }
 0xc0c   :  { %846 = vrot.lane.b32.xlu2 %v1237_v60, %s1261_s4 }
 0xc0d   :  { %v1239_v1 = vpop.eup %1238 }
 0xc0e   :  { %v827_v5 = vadd.f32 1.0, %v1239_v1 }
 0xc10   :  { %1240 = vrcp.f32 %v827_v5  ;;  %v839_v13 = vand.u32 2147483648, %v827_v5  ;;  %vm833_vm6 = vweird.f32 %v827_v5  ;;  %v837_v26 = vand.u32 2147483647, %v827_v5 }
 0xc12   :  { %v840_v23 = vor.u32 1.1754944e-38, %v839_v13  ;;  %vm838_vm8 = vcmp.eq.f32.partialorder %v837_v26, 8.507059e+37 }
 0xc14   :  { %865 = vperm.xlu2 %1194, %v863_v49  }
 0xc16   :  { %v1241_v2 = vpop.eup %1240 }
 0xc17   :  { %v829_v4 = vmul.f32 %v1241_v2, %v827_v5  ;;  %vm834_vm5 = vweird.f32 %v1241_v2 }
 0xc18   :  { %vm835_vm7 = vmor %vm833_vm6, %vm834_vm5 }
 0xc19   :  { %v830_v7 = vsub.f32 1.0, %v829_v4 }
 0xc1b   :  { %v831_v3 = vmul.f32 %v1241_v2, %v830_v7 }
 0xc1d   :  { %v832_v19 = vadd.f32 %v1241_v2, %v831_v3 }
 0xc1f   :  { %v836_v28 = vsel %vm835_vm7, %v1241_v2, %v832_v19 }
 0xc20   :  { %v841_v6 = vsel %vm838_vm8, %v840_v23, %v836_v28 }
 0xc21   :  { %v844_v27 = vmul.f32 %v841_v6, %v735_v9 }
 0xc66   :  { %v847_v61 = vpop.permute.xlu2 %846 }
 0xc67   :  { %v849_v16 = vmul.f32 %v847_v61, %v841_v6 }
 0xc69   :  { %851 = vrot.lane.b32.xlu0 %v849_v16, %s1261_s4 }
 0xc6e   :  { %v866_v15 = vpop.permute.xlu2 %865 }
 0xc6f   :  { %vm867_vm9 = vcmp.eq.s32.totalorder %v866_v15, 1 }
 0xcdb   :  { %v852_v29 = vpop.permute.xlu0 %851 }
 0xcdc   :  { %v854_v11 = vadd.f32 %v852_v29, %v844_v27 }
 0xcde   :  { %1242 = vtanh.f32 %v854_v11  ;;  %v1662_v26 = vsel %vm867_vm9, %v854_v11, %v735_v9 }
 0xce4   :  { %v1243_v14 = vpop.eup %1242 }
 0xce5   :  { %857 = vrot.lane.b32.xlu1 %v1243_v14, %s1261_s4 }
 0xd57   :  { %v858_v18 = vpop.permute.xlu1 %857 }
 0xd58   :  { %v860_v20 = vmul.f32 %v858_v18, %v841_v6  ;;  %v203_v18 = vperm.slane %v1453_v0, 0 }
 0xd5a   :  { %v1640_v24 = vsel %vm867_vm9, %v860_v20, 0.0  ;;  %v868_v30 = vsel %vm867_vm9, %v860_v20, %v734_v32  ;;  %v220_v20 = vperm.slane %v1492_v58, 0  ;;  %v739_v58 = vperm.slane %v1615_v12, 0 }
 0xd5b   :  { %899 = vrot.lane.b32.xlu0 %v868_v30, %s1263_s1  ;;  %883 = vst [vmem:[#allocation1] sm:$0xff] %v1640_v24 }
 0xd62   :  { %v885_v14 = vld [vmem:[#allocation1 + $0x2] ss:$9 sm:$0xff] }
 0xd63   :  { %v1678_v15 = vld [vmem:[#allocation1 + $0x3] ss:$9 sm:$0xff] }
 0xdcd   :  { %v900_v17 = vpop.permute.xlu0 %899 }
 0xdce   :  { %1182 = vmatmul.msk.f32.vlgmr.msrb.gmra.mxu0 %vm36_vm0, %v900_v17  ;;  %1183 = vmatmul.msk.f32.vlgmr.msrb.gmra.mxu1 %vm36_vm0, %v900_v17  ;;  %v1123_v17 = vsel %vm150_vm1, %v597_v8, %v595_v10 }
 0xdcf   :  { %vm1124_vm2 = vcmp.gt.f32.partialorder %v1123_v17, 0.0 }
 0xe4b   :  { %v920_v21 = vpop.f32.mrf.mxu0  ;;  %v940_v36 = vpop.f32.mrf.mxu1 }
 0xe4c   :  { %v944_v34 = vrot.slane %v920_v21, 4  ;;  %v947_v32 = vadd.f32 %v940_v36, %v1415_v22  ;;  %v359_v21 = vperm.slane %v1542_v44, 0  ;;  %v888_v44 = vperm.slane %v885_v14, 0 }
 0xe4e   :  { %v946_v37 = vadd.f32 %v944_v34, %v1605_v62  ;;  %v488_v34 = vperm.slane %v1596_v40, 0 }
 0xe50   :  { %v949_v38 = vrot.slane %v946_v37, 4 }
 0xe52   :  { %v951_v39 = vsel %vm150_vm1, %v949_v38, %v947_v32 }
 0xe53   :  { %1244 = vtanh.f32 %v951_v39  ;;  %v1184_v43 = vmul.f32 -1.442695, %v951_v39 }
 0xe55   :  { %1246 = vpow2.f32 %v1184_v43 }
 0xe59   :  { %v1245_v41 = vpop.eup %1244 }
 0xe5a   :  { %974 = vrot.lane.b32.xlu1 %v1245_v41, %s1261_s4 }
 0xe5b   :  { %v1247_v50 = vpop.eup %1246 }
 0xe5c   :  { %v955_v60 = vadd.f32 1.0, %v1247_v50 }
 0xe5e   :  { %1248 = vrcp.f32 %v955_v60  ;;  %v967_v2 = vand.u32 2147483648, %v955_v60  ;;  %vm961_vm12 = vweird.f32 %v955_v60  ;;  %v965_v56 = vand.u32 2147483647, %v955_v60 }
 0xe60   :  { %v968_v7 = vor.u32 1.1754944e-38, %v967_v2  ;;  %vm966_vm14 = vcmp.eq.f32.partialorder %v965_v56, 8.507059e+37 }
 0xe62   :  { %993 = vperm.xlu1 %1193, %v991_v46  }
 0xe64   :  { %v1249_v59 = vpop.eup %1248 }
 0xe65   :  { %v957_v49 = vmul.f32 %v1249_v59, %v955_v60  ;;  %vm962_vm11 = vweird.f32 %v1249_v59 }
 0xe66   :  { %vm963_vm13 = vmor %vm961_vm12, %vm962_vm11 }
 0xe67   :  { %v958_v63 = vsub.f32 1.0, %v957_v49 }
 0xe69   :  { %v959_v1 = vmul.f32 %v1249_v59, %v958_v63 }
 0xe6b   :  { %v960_v5 = vadd.f32 %v1249_v59, %v959_v1 }
 0xe6d   :  { %v964_v4 = vsel %vm963_vm13, %v1249_v59, %v960_v5 }
 0xe6e   :  { %v969_v19 = vsel %vm966_vm14, %v968_v7, %v964_v4  ;;  %v202_v7 = vrot.slane %v1453_v0, 1  ;;  %v626_v0 = vperm.slane %v1618_v33, 0 }
 0xe6f   :  { %v972_v28 = vmul.f32 %v969_v19, %v1662_v26 }
 0xecc   :  { %v975_v3 = vpop.permute.xlu1 %974 }
 0xecd   :  { %v977_v13 = vmul.f32 %v975_v3, %v969_v19  ;;  %v204_v3 = vperm.slane %v202_v7, 0 }
 0xecf   :  { %979 = vrot.lane.b32.xlu2 %v977_v13, %s1261_s4  ;;  %v473_v13 = vperm.slane %v1546_v47, 0 }
 0xed4   :  { %v1669_v16 = vpop.permute.xlu1 %993 }
 0xed5   :  { %vm995_vm15 = vcmp.eq.s32.totalorder %v1669_v16, 1  ;;  %v872_v16 = vrot.slane %v1640_v24, 1 }
 0xf29   :  { %v980_v23 = vpop.permute.xlu2 %979 }
 0xf2a   :  { %v1665_v61 = vadd.f32 %v980_v23, %v972_v28  ;;  %v489_v28 = vperm.slane %v1589_v45, 0  ;;  %v738_v23 = vrot.slane %v1615_v12, 1 }
 0xf2c   :  { %1250 = vtanh.f32 %v1665_v61 }
 0xf32   :  { %v1251_v6 = vpop.eup %1250 }
 0xf33   :  { %985 = vrot.lane.b32.xlu0 %v1251_v6, %s1261_s4  ;;  %v740_v6 = vperm.slane %v738_v23, 0 }
 0xfa5   :  { %v986_v27 = vpop.permute.xlu0 %985 }
 0xfa6   :  { %v988_v29 = vmul.f32 %v986_v27, %v969_v19  ;;  %v343_v19 = vperm.slane %v1495_v54, 0 }
 0xfa8   :  { %v1674_v9 = vsel %vm995_vm15, %v988_v29, 0.0  ;;  %v996_v11 = vsel %vm995_vm15, %v988_v29, %v868_v30  ;;  %v1125_v30 = vsel %vm1124_vm2, 1, %v1262_v51  ;;  %v755_v51 = vperm.slane %v1645_v25, 0 }
 0xfa9   :  { %1027 = vrot.lane.b32.xlu2 %v996_v11, %s1263_s1  ;;  %1011 = vst [vmem:[#allocation1] sm:$0xff] %v1674_v9  ;;  %v1000_v10 = vrot.slane %v1674_v9, 1  ;;  %v889_v29 = vperm.slane %v1678_v15, 0 }
 0xfab   :  { %v1002_v8 = vperm.slane %v1000_v10, 0  ;;  %v219_v10 = vperm.slane %v1490_v53, 0 }
 0xfb0   :  { %v1013_v45 = vld [vmem:[#allocation1 + $0x2] ss:$9 sm:$0xff] }
 0xfb1   :  { %205 = vrot.lane.b32.xlu2 %v203_v18, %s1263_s1  ;;  %v1016_v11 = vperm.slane %v1013_v45, 0 }
 0xfb9   :  { %223 = vrot.lane.b32.xlu2 %v220_v20, %s1264_s7 }
 0xfc1   :  { %1127 = vperm.xlu2 %1194, %v1125_v30  }
 0xfc9   :  { %362 = vrot.lane.b32.xlu2 %v359_v21, %s1264_s7 }
 0xfd1   :  { %490 = vrot.lane.b32.xlu2 %v488_v34, %s1264_s7 }
 0xfd9   :  { %615 = vrot.lane.b32.xlu2 %v612_v55, %s1263_s1 }
 0xfe1   :  { %741 = vrot.lane.b32.xlu2 %v739_v58, %s1263_s1 }
 0xfe9   :  { %758 = vrot.lane.b32.xlu2 %v755_v51, %s1264_s7 }
 0xff1   :  { %890 = vrot.lane.b32.xlu2 %v888_v44, %s1264_s7 }
 0xff9   :  { %1005 = vrot.lane.b32.xlu2 %v1002_v8, %s1263_s1 }
0x1003   :  { %v1028_v40 = vpop.permute.xlu2 %1027 }
0x1004   :  { %1185 = vmatmul.msk.f32.vlgmr.msra.gmra.mxu2 %vm36_vm0, %v1028_v40  ;;  %1186 = vmatmul.msk.f32.vlgmr.msra.gmra.mxu3 %vm36_vm0, %v1028_v40  ;;  %v358_v40 = vperm.slane %v1540_v52, 0 }
0x100b   :  { %v206_v36 = vpop.permute.xlu2 %205 }
0x100c   :  { %212 = vst.msk [vmem:[%s1899_s5] sm:$0x1] %vm211_vm3, %v206_v36  ;;  %v472_v36 = vrot.slane %v1546_v47, 1 }
0x100e   :  { %v474_v53 = vperm.slane %v472_v36, 0 }
0x1013   :  { %v224_v25 = vpop.permute.xlu2 %223 }
0x1014   :  { %229 = vst.msk [vmem:[%s1899_s5 + $0xf] sm:$0x1] %vm227_vm4, %v224_v25 }
0x101b   :  { %v1715_v37 = vpop.permute.xlu2 %1127 }
0x101c   :  { %vm1129_vm7 = vcmp.eq.s32.totalorder %v1715_v37, 1 }
0x1023   :  { %v363_v38 = vpop.permute.xlu2 %362 }
0x1024   :  { %367 = vst.msk [vmem:[%s1899_s5 + $0xe] sm:$0x1] %vm227_vm4, %v363_v38 }
0x102b   :  { %v491_v32 = vpop.permute.xlu2 %490 }
0x102c   :  { %496 = vst.msk [vmem:[%s1899_s5 + $0x5] sm:$0x1] %vm227_vm4, %v491_v32 }
0x1033   :  { %v616_v39 = vpop.permute.xlu2 %615 }
0x1034   :  { %620 = vst.msk [vmem:[%s1899_s5 + $0xb] sm:$0x1] %vm211_vm3, %v616_v39 }
0x103b   :  { %v1729_v41 = vpop.permute.xlu2 %741 }
0x1043   :  { %v759_v42 = vpop.permute.xlu2 %758 }
0x1044   :  { %763 = vst.msk [vmem:[%s1899_s5 + $0xb] sm:$0x1] %vm227_vm4, %v759_v42 }
0x104b   :  { %v1735_v46 = vpop.permute.xlu2 %890 }
0x1053   :  { %v1006_v43 = vpop.permute.xlu2 %1005 }
0x1054   :  { %1010 = vst.msk [vmem:[%s1899_s5 + $0xe] sm:$0x1] %vm211_vm3, %v1006_v43  ;;  %v997_v43 = vsel %vm995_vm15, %v1665_v61, %v1662_v26  ;;  %v627_v61 = vperm.slane %v1620_v35, 0  ;;  %v1001_v35 = vperm.slane %v1674_v9, 0 }
0x1087   :  { %v1048_v50 = vpop.f32.mrf.mxu2  ;;  %v1068_v60 = vpop.f32.mrf.mxu3 }
0x1088   :  { %v1072_v59 = vrot.slane %v1048_v50, 2  ;;  %v1076_v49 = vrot.slane %v1068_v60, 2 }
0x108a   :  { %v1074_v63 = vadd.f32 %v1072_v59, %v1605_v62  ;;  %v1078_v1 = vadd.f32 %v1076_v49, %v1415_v22  ;;  %v342_v62 = vrot.slane %v1495_v54, 1  ;;  %v873_v54 = vperm.slane %v1640_v24, 0 }
0x108c   :  { %v1080_v5 = vrot.slane %v1074_v63, 6  ;;  %v1083_v2 = vrot.slane %v1078_v1, 6  ;;  %v344_v22 = vperm.slane %v342_v62, 0  ;;  %v611_v1 = vperm.slane %v1592_v48, 0 }
0x108d   :  { %v754_v48 = vperm.slane %v1643_v31, 0 }
0x108e   :  { %v1085_v56 = vsel %vm150_vm1, %v1080_v5, %v1083_v2  ;;  %v874_v5 = vperm.slane %v872_v16, 0  ;;  %v1015_v2 = vld [vmem:[#allocation1 + $0x3] ss:$9 sm:$0xff] }
0x108f   :  { %1252 = vtanh.f32 %v1085_v56  ;;  %v1187_v27 = vmul.f32 -1.442695, %v1085_v56  ;;  %v1017_v56 = vperm.slane %v1015_v2, 0 }
0x1091   :  { %1254 = vpow2.f32 %v1187_v27 }
0x1095   :  { %v1253_v4 = vpop.eup %1252 }
0x1096   :  { %1108 = vrot.lane.b32.xlu0 %v1253_v4, %s1261_s4 }
0x1097   :  { %v1255_v33 = vpop.eup %1254 }
0x1098   :  { %v1089_v14 = vadd.f32 1.0, %v1255_v33 }
0x109a   :  { %1256 = vrcp.f32 %v1089_v14  ;;  %v1101_v21 = vand.u32 2147483648, %v1089_v14  ;;  %vm1095_vm1 = vweird.f32 %v1089_v14  ;;  %v1099_v34 = vand.u32 2147483647, %v1089_v14 }
0x109c   :  { %v1102_v57 = vor.u32 1.1754944e-38, %v1101_v21  ;;  %vm1100_vm6 = vcmp.eq.f32.partialorder %v1099_v34, 8.507059e+37 }
0x109e   :  { %207 = vrot.lane.b32.xlu0 %v204_v3, %s1263_s1 }
0x10a0   :  { %v1257_v12 = vpop.eup %1256 }
0x10a1   :  { %v1091_v18 = vmul.f32 %v1257_v12, %v1089_v14  ;;  %vm1096_vm0 = vweird.f32 %v1257_v12 }
0x10a2   :  { %vm1097_vm5 = vmor %vm1095_vm1, %vm1096_vm0 }
0x10a3   :  { %v1092_v20 = vsub.f32 1.0, %v1091_v18 }
0x10a5   :  { %v1093_v17 = vmul.f32 %v1257_v12, %v1092_v20 }
0x10a6   :  { %345 = vrot.lane.b32.xlu0 %v343_v19, %s1263_s1 }
0x10a7   :  { %v1094_v30 = vadd.f32 %v1257_v12, %v1093_v17 }
0x10a9   :  { %v1098_v15 = vsel %vm1097_vm5, %v1257_v12, %v1094_v30 }
0x10aa   :  { %v1103_v58 = vsel %vm1100_vm6, %v1102_v57, %v1098_v15 }
0x10ae   :  { %347 = vrot.lane.b32.xlu0 %v344_v22, %s1263_s1 }
0x10b6   :  { %475 = vrot.lane.b32.xlu0 %v473_v13, %s1263_s1 }
0x10be   :  { %492 = vrot.lane.b32.xlu0 %v489_v28, %s1264_s7 }
0x10c6   :  { %628 = vrot.lane.b32.xlu0 %v626_v0, %s1264_s7 }
0x10ce   :  { %743 = vrot.lane.b32.xlu0 %v740_v6, %s1263_s1 }
0x10d6   :  { %875 = vrot.lane.b32.xlu0 %v873_v54, %s1263_s1 }
0x10de   :  { %892 = vrot.lane.b32.xlu0 %v889_v29, %s1264_s7 }
0x10e6   :  { %1018 = vrot.lane.b32.xlu0 %v1016_v11, %s1264_s7 }
0x1108   :  { %v1109_v55 = vpop.permute.xlu0 %1108 }
0x1109   :  { %v1111_v51 = vmul.f32 %v1109_v55, %v1103_v58 }
0x110b   :  { %1113 = vrot.lane.b32.xlu1 %v1111_v51, %s1261_s4 }
0x1110   :  { %v208_v44 = vpop.permute.xlu0 %207 }
0x1111   :  { %213 = vst.msk [vmem:[%s1899_s5 + $0x8] sm:$0x1] %vm211_vm3, %v208_v44 }
0x1113   :  { %221 = vrot.lane.b32.xlu1 %v219_v10, %s1264_s7 }
0x1118   :  { %v346_v8 = vpop.permute.xlu0 %345 }
0x1119   :  { %351 = vst.msk [vmem:[%s1899_s5 + $0x1] sm:$0x1] %vm211_vm3, %v346_v8 }
0x111b   :  { %360 = vrot.lane.b32.xlu1 %v358_v40, %s1264_s7 }
0x1120   :  { %v348_v25 = vpop.permute.xlu0 %347 }
0x1121   :  { %352 = vst.msk [vmem:[%s1899_s5 + $0x9] sm:$0x1] %vm211_vm3, %v348_v25 }
0x1123   :  { %477 = vrot.lane.b32.xlu1 %v474_v53, %s1263_s1 }
0x1128   :  { %v476_v38 = vpop.permute.xlu0 %475 }
0x1129   :  { %481 = vst.msk [vmem:[%s1899_s5 + $0x2] sm:$0x1] %vm211_vm3, %v476_v38 }
0x112a   :  { %896 = vst.msk [vmem:[%s1899_s5 + $0x2] sm:$0x1] %vm227_vm4, %v1735_v46 }
0x1130   :  { %v493_v52 = vpop.permute.xlu0 %492 }
0x1131   :  { %497 = vst.msk [vmem:[%s1899_s5 + $0xd] sm:$0x1] %vm227_vm4, %v493_v52 }
0x1138   :  { %v629_v47 = vpop.permute.xlu0 %628 }
0x1139   :  { %634 = vst.msk [vmem:[%s1899_s5 + $0x4] sm:$0x1] %vm227_vm4, %v629_v47 }
0x113a   :  { %747 = vst.msk [vmem:[%s1899_s5 + $0x4] sm:$0x1] %vm211_vm3, %v1729_v41  ;;  %v1106_v41 = vmul.f32 %v1103_v58, %v997_v43 }
0x1140   :  { %v744_v32 = vpop.permute.xlu0 %743 }
0x1148   :  { %v876_v39 = vpop.permute.xlu0 %875 }
0x1149   :  { %881 = vst.msk [vmem:[%s1899_s5 + $0x5] sm:$0x1] %vm211_vm3, %v876_v39 }
0x1150   :  { %v893_v42 = vpop.permute.xlu0 %892 }
0x1158   :  { %v1019_v46 = vpop.permute.xlu0 %1018 }
0x1159   :  { %1024 = vst.msk [vmem:[%s1899_s5 + $0x1] sm:$0x1] %vm227_vm4, %v1019_v46 }
0x117d   :  { %v1114_v50 = vpop.permute.xlu1 %1113 }
0x117e   :  { %v1116_v60 = vadd.f32 %v1114_v50, %v1106_v41 }
0x1180   :  { %1258 = vtanh.f32 %v1116_v60 }
0x1185   :  { %v222_v59 = vpop.permute.xlu1 %221 }
0x1186   :  { %v1259_v49 = vpop.eup %1258  ;;  %228 = vst.msk [vmem:[%s1899_s5 + $0x7] sm:$0x1] %vm227_vm4, %v222_v59 }
0x1187   :  { %1119 = vrot.lane.b32.xlu1 %v1259_v49, %s1261_s4 }
0x118d   :  { %v361_v63 = vpop.permute.xlu1 %360 }
0x118e   :  { %366 = vst.msk [vmem:[%s1899_s5 + $0x6] sm:$0x1] %vm227_vm4, %v361_v63 }
0x118f   :  { %613 = vrot.lane.b32.xlu1 %v611_v1, %s1263_s1 }
0x1195   :  { %v478_v26 = vpop.permute.xlu1 %477 }
0x1196   :  { %482 = vst.msk [vmem:[%s1899_s5 + $0xa] sm:$0x1] %vm211_vm3, %v478_v26 }
0x1197   :  { %897 = vst.msk [vmem:[%s1899_s5 + $0xa] sm:$0x1] %vm227_vm4, %v893_v42  ;;  %630 = vrot.lane.b32.xlu1 %v627_v61, %s1264_s7 }
0x119f   :  { %756 = vrot.lane.b32.xlu1 %v754_v48, %s1264_s7 }
0x11a7   :  { %877 = vrot.lane.b32.xlu1 %v874_v5, %s1263_s1 }
0x11af   :  { %1003 = vrot.lane.b32.xlu1 %v1001_v35, %s1263_s1 }
0x11b7   :  { %1020 = vrot.lane.b32.xlu1 %v1017_v56, %s1264_s7 }
0x11f9   :  { %v1120_v4 = vpop.permute.xlu1 %1119 }
0x11fa   :  { %v1122_v7 = vmul.f32 %v1120_v4, %v1103_v58 }
0x11fc   :  { %v1130_v31 = vsel %vm1129_vm7, %v1122_v7, 0.0 }
0x11fd   :  { %1143 = vst [vmem:[#allocation1] sm:$0xff] %v1130_v31  ;;  %v1133_v3 = vperm.slane %v1130_v31, 0  ;;  %v1132_v19 = vrot.slane %v1130_v31, 1 }
0x11ff   :  { %1135 = vrot.lane.b32.xlu2 %v1133_v3, %s1263_s1  ;;  %v1134_v24 = vperm.slane %v1132_v19, 0 }
0x1201   :  { %v614_v62 = vpop.permute.xlu1 %613  ;;  %1137 = vrot.lane.b32.xlu0 %v1134_v24, %s1263_s1 }
0x1202   :  { %619 = vst.msk [vmem:[%s1899_s5 + $0x3] sm:$0x1] %vm211_vm3, %v614_v62 }
0x1204   :  { %v1145_v9 = vld [vmem:[#allocation1 + $0x2] ss:$9 sm:$0xff] }
0x1205   :  { %v1147_v22 = vld [vmem:[#allocation1 + $0x3] ss:$9 sm:$0xff]  ;;  %v1148_v13 = vperm.slane %v1145_v9, 0 }
0x1206   :  { %v1149_v28 = vperm.slane %v1147_v22, 0 }
0x1207   :  { %1150 = vrot.lane.b32.xlu1 %v1148_v13, %s1264_s7 }
0x1208   :  { %1152 = vrot.lane.b32.xlu2 %v1149_v28, %s1264_s7 }
0x1209   :  { %v631_v37 = vpop.permute.xlu1 %630 }
0x120a   :  { %635 = vst.msk [vmem:[%s1899_s5 + $0xc] sm:$0x1] %vm227_vm4, %v631_v37 }
0x120b   :  { %748 = vst.msk [vmem:[%s1899_s5 + $0xc] sm:$0x1] %vm211_vm3, %v744_v32 }
0x1211   :  { %v757_v0 = vpop.permute.xlu1 %756 }
0x1212   :  { %762 = vst.msk [vmem:[%s1899_s5 + $0x3] sm:$0x1] %vm227_vm4, %v757_v0 }
0x1219   :  { %v878_v23 = vpop.permute.xlu1 %877 }
0x121a   :  { %882 = vst.msk [vmem:[%s1899_s5 + $0xd] sm:$0x1] %vm211_vm3, %v878_v23 }
0x1221   :  { %v1004_v6 = vpop.permute.xlu1 %1003 }
0x1222   :  { %1009 = vst.msk [vmem:[%s1899_s5 + $0x6] sm:$0x1] %vm211_vm3, %v1004_v6 }
0x1229   :  { %v1021_v54 = vpop.permute.xlu1 %1020 }
0x122a   :  { %1025 = vst.msk [vmem:[%s1899_s5 + $0x9] sm:$0x1] %vm227_vm4, %v1021_v54 }
0x1259   :  { %v1136_v27 = vpop.permute.xlu2 %1135 }
0x125a   :  { %1141 = vst.msk [vmem:[%s1899_s5 + $0x7] sm:$0x1] %vm211_vm3, %v1136_v27 }
0x1262   :  { %v1153_v29 = vpop.permute.xlu2 %1152 }
0x1263   :  { %1157 = vst.msk [vmem:[%s1899_s5 + $0x8] sm:$0x1] %vm227_vm4, %v1153_v29 }
0x1273   :  { %v1138_v45 = vpop.permute.xlu0 %1137 }
0x1274   :  { %1142 = vst.msk [vmem:[%s1899_s5 + $0xf] sm:$0x1] %vm211_vm3, %v1138_v45 }
0x1279   :  { %v1151_v11 = vpop.permute.xlu1 %1150 }
0x127a   :  { %1156 = vst.msk [vmem:[%s1899_s5] sm:$0x1] %vm227_vm4, %v1151_v11 }

</bundles_post_ra>
